<compile_context>
chip_gen: v6e
topology: v6e:2x2x1
jax: 0.10.0
libtpu: 0.0.40
codegen_flags: <defaults>
</compile_context>

<pallas_src>
import functools
from math import sqrt

import jax
import jax.numpy as jnp
from jax import lax
from jax.experimental import pallas as pl
from jax.experimental.pallas import tpu as pltpu


def _attention_layer3_kernel(
    q1_ref, k1_ref, v1_ref, q2_ref, k2_ref,
    wq1_ref, bq1_ref, wk1_ref, bk1_ref, wv1_ref, bv1_ref,
    wq2_ref, bq2_ref, wk2_ref, bk2_ref,
    wo1_ref, bo1_ref,
    o_ref, *rest,
    n_heads, d_keys, d_values, return_attn,
):
    """One grid step == one (batch element b, L-tile l).

    q1/q2 : (1, tL, D)   k1/k2/v1 : (1, S, D)   (all bf16)
    wq/wk : (D, H*dk)    wv : (D, H*dv)    wo1 : (H*dv, D)   (all bf16)
    biases: (1, X) f32
    o_ref : (1, tL, D)   attn_ref (optional): (1, H, tL, S)
    scratch: kc_ref (S, 2*H*dk) bf16, vp_ref (S, H*dv) bf16  (persist across L-tiles)
    """
    if return_attn:
        attn_ref, kc_ref, vp_ref = rest
    else:
        (kc_ref, vp_ref), attn_ref = rest, None

    H, dk, dv = n_heads, d_keys, d_values
    f32, bf16 = jnp.float32, jnp.bfloat16
    scale = 1.0 / sqrt(dk)
    l = pl.program_id(1)

    # ---- K/V-side projections: once per batch element, cached in VMEM scratch ----
    @pl.when(l == 0)
    def _():
        k1 = k1_ref[0]                                    # (S, D)
        k2 = k2_ref[0]
        v1 = v1_ref[0]
        kp1 = (jnp.dot(k1, wk1_ref[...], preferred_element_type=f32)
               + bk1_ref[...]).astype(bf16)               # (S, H*dk)
        kp2 = (jnp.dot(k2, wk2_ref[...], preferred_element_type=f32)
               + bk2_ref[...]).astype(bf16)
        # Interleave per head: lanes [h*2dk : h*2dk+dk) = stream 1, next dk = stream 2,
        # so the fused score contraction is a single static lane slice per head.
        parts = []
        for h in range(H):
            parts.append(kp1[:, h * dk:(h + 1) * dk])
            parts.append(kp2[:, h * dk:(h + 1) * dk])
        kc_ref[...] = jnp.concatenate(parts, axis=-1)     # (S, 2*H*dk)
        vp_ref[...] = (jnp.dot(v1, wv1_ref[...], preferred_element_type=f32)
                       + bv1_ref[...]).astype(bf16)       # (S, H*dv)

    # ---- Q-side projections for this L-tile (softmax scale folded into Q) ----
    q1 = q1_ref[0]                                        # (tL, D)
    q2 = q2_ref[0]
    qp1 = ((jnp.dot(q1, wq1_ref[...], preferred_element_type=f32)
            + bq1_ref[...]) * scale).astype(bf16)
    qp2 = ((jnp.dot(q2, wq2_ref[...], preferred_element_type=f32)
            + bq2_ref[...]) * scale).astype(bf16)
    qparts = []
    for h in range(H):
        qparts.append(qp1[:, h * dk:(h + 1) * dk])
        qparts.append(qp2[:, h * dk:(h + 1) * dk])
    qc = jnp.concatenate(qparts, axis=-1)                 # (tL, 2*H*dk)

    kc = kc_ref[...]                                      # (S, 2*H*dk)
    vp = vp_ref[...]                                      # (S, H*dv)

    # ---- Per-head fused two-stream attention (static lane slices, no stacking) ----
    ctx_parts = []
    for h in range(H):
        qh = qc[:, h * 2 * dk:(h + 1) * 2 * dk]           # (tL, 2dk)
        kh = kc[:, h * 2 * dk:(h + 1) * 2 * dk]           # (S, 2dk)
        # One MXU contraction of depth 2*dk == q1·k1ᵀ + q2·k2ᵀ.
        s = lax.dot_general(qh, kh, (((1,), (1,)), ((), ())),
                            preferred_element_type=f32)   # (tL, S)
        m = jnp.max(s, axis=-1, keepdims=True)
        e = jnp.exp(s - m)
        p = e * pl.reciprocal(jnp.sum(e, axis=-1, keepdims=True), approx=True)
        if return_attn:
            attn_ref[0, h] = p.astype(attn_ref.dtype)
        vh = vp[:, h * dv:(h + 1) * dv]                   # (S, dv)
        ctx_parts.append(jnp.dot(p.astype(bf16), vh,
                                 preferred_element_type=f32).astype(bf16))

    # ---- Packed output projection: one full-depth (K = H*dv) matmul ----
    ctx = jnp.concatenate(ctx_parts, axis=-1)             # (tL, H*dv) bf16
    o_ref[0] = (jnp.dot(ctx, wo1_ref[...], preferred_element_type=f32)
                + bo1_ref[...]).astype(o_ref.dtype)


def _chip_kind():
    try:
        return jax.devices()[0].device_kind.lower()
    except Exception:
        return ""


def _choose_tile_l(L, kind):
    # v7x has only 64 MiB VMEM per TC -> smaller L tiles; v5e/v6e can take 256.
    target = 128 if ("v7" in kind or "7x" in kind) else 256
    if L <= target:
        return L
    for t in (256, 128, 64, 32, 16, 8):
        if t <= target and L % t == 0:
            return t
    # TODO(synk): pad ragged L instead of falling back to an un-tiled block.
    return L


def _default_vmem_limit(kind):
    if "v5" in kind or "v6" in kind:
        return 100 * 1024 * 1024      # 128 MiB physical VMEM
    return 48 * 1024 * 1024           # v7x / unknown: 64 MiB physical per TC -> headroom


def attention_layer3_pallas(q1, k1, v1, q2, k2, v2, params, *, n_heads,
                            attn_mask=None, return_attn=True,
                            attn_dtype=jnp.bfloat16, tile_l=None,
                            vmem_limit_bytes=None):
    """q1/q2: (B, L, D), k1/k2/v1/v2: (B, S, D).

    Returns (out (B, L, D), attn (B, H, L, S) or None).
    attn_mask is accepted for signature parity but unused (unmasked attention).
    return_attn=False skips the O(B*H*L*S) HBM write-back (biggest perf lever).
    # TODO(synk): masked / causal inner attention not implemented.
    """
    del attn_mask, v2  # v2 is projected by the module but unused by this inner attention.
    B, L, D = q1.shape
    _, S, _ = k1.shape
    H = n_heads
    Hdk = params["wq1"].shape[1]
    Hdv = params["wv1"].shape[1]
    dk, dv = Hdk // H, Hdv // H

    kind = _chip_kind()
    tL = tile_l or _choose_tile_l(L, kind)
    assert L % tL == 0, "query length must be divisible by the L tile"
    nL = L // tL
    vmem_limit = vmem_limit_bytes or _default_vmem_limit(kind)

    bf16 = jnp.bfloat16
    # bf16 operands for the MXU (accumulation stays f32 inside the kernel); also
    # halves input/weight DMA traffic.
    q1b, k1b, v1b, q2b, k2b = (x.astype(bf16) for x in (q1, k1, v1, q2, k2))
    wq1, wk1, wv1, wq2, wk2, wo1 = (
        params[n].astype(bf16) for n in ("wq1", "wk1", "wv1", "wq2", "wk2", "wo1"))
    bq1, bk1, bv1, bq2, bk2, bo1 = (
        params[n] for n in ("bq1", "bk1", "bv1", "bq2", "bk2", "bo1"))

    kernel = functools.partial(
        _attention_layer3_kernel,
        n_heads=H, d_keys=dk, d_values=dv, return_attn=return_attn,
    )

    def full(arr):
        nd = arr.ndim
        # Constant index_map -> fetched once; single-buffer to halve weight VMEM.
        return pl.BlockSpec(arr.shape, lambda b, l, _n=nd: (0,) * _n,
                            pipeline_mode=pl.Buffered(1))

    in_specs = [
        pl.BlockSpec((1, tL, D), lambda b, l: (b, l, 0)),   # q1
        pl.BlockSpec((1, S, D), lambda b, l: (b, 0, 0)),    # k1 (constant in l)
        pl.BlockSpec((1, S, D), lambda b, l: (b, 0, 0)),    # v1
        pl.BlockSpec((1, tL, D), lambda b, l: (b, l, 0)),   # q2
        pl.BlockSpec((1, S, D), lambda b, l: (b, 0, 0)),    # k2
        full(wq1), full(bq1), full(wk1), full(bk1), full(wv1), full(bv1),
        full(wq2), full(bq2), full(wk2), full(bk2),
        full(wo1), full(bo1),
    ]

    out_spec_o = pl.BlockSpec((1, tL, D), lambda b, l: (b, l, 0))
    if return_attn:
        out_shape = (jax.ShapeDtypeStruct((B, L, D), q1.dtype),
                     jax.ShapeDtypeStruct((B, H, L, S), attn_dtype))
        out_specs = [out_spec_o,
                     pl.BlockSpec((1, H, tL, S), lambda b, l: (b, 0, l, 0))]
    else:
        out_shape = jax.ShapeDtypeStruct((B, L, D), q1.dtype)
        out_specs = out_spec_o

    grid_spec = pltpu.PrefetchScalarGridSpec(
        num_scalar_prefetch=0,
        # B outer "parallel" (megacore on v7x), L inner "arbitrary" so the
        # K/V-projection scratch computed at l==0 persists across L tiles.
        grid=(B, nL),
        in_specs=in_specs,
        out_specs=out_specs,
        scratch_shapes=[
            pltpu.VMEM((S, 2 * H * dk), bf16),   # per-head interleaved [K1|K2] projections
            pltpu.VMEM((S, H * dv), bf16),       # V1 projection
        ],
    )

    result = pl.pallas_call(
        kernel,
        out_shape=out_shape,
        grid_spec=grid_spec,
        compiler_params=pltpu.CompilerParams(
            dimension_semantics=("parallel", "arbitrary"),
            vmem_limit_bytes=vmem_limit,
        ),
    )(
        q1b, k1b, v1b, q2b, k2b,
        wq1, bq1, wk1, bk1, wv1, bv1,
        wq2, bq2, wk2, bk2,
        wo1, bo1,
    )

    if return_attn:
        out, attn = result
        return out, attn
    return result, None


def attention_layer3_ref(q1, k1, v1, q2, k2, v2, params, *, n_heads):
    """Plain-JAX f32 reference mirroring the assumed forward (mix=False)."""
    del v2
    B, L, D = q1.shape
    _, S, _ = k1.shape
    H = n_heads
    qp1 = q1 @ params["wq1"] + params["bq1"][0]
    kp1 = k1 @ params["wk1"] + params["bk1"][0]
    vp1 = v1 @ params["wv1"] + params["bv1"][0]
    qp2 = q2 @ params["wq2"] + params["bq2"][0]
    kp2 = k2 @ params["wk2"] + params["bk2"][0]
    dk = qp1.shape[-1] // H
    dv = vp1.shape[-1] // H
    q1h = qp1.reshape(B, L, H, dk); k1h = kp1.reshape(B, S, H, dk)
    q2h = qp2.reshape(B, L, H, dk); k2h = kp2.reshape(B, S, H, dk)
    v1h = vp1.reshape(B, S, H, dv)
    s = (jnp.einsum("blhe,bshe->bhls", q1h, k1h)
         + jnp.einsum("blhe,bshe->bhls", q2h, k2h)) / sqrt(dk)
    attn = jax.nn.softmax(s, axis=-1)
    out1 = jnp.einsum("bhls,bshd->blhd", attn, v1h).reshape(B, L, H * dv)
    out = out1 @ params["wo1"] + params["bo1"][0]
    return out, attn


def init_params(key, d_model, n_heads, d_keys=None, d_values=None):
    d_keys = d_keys or d_model // n_heads
    d_values = d_values or d_model // n_heads
    Hdk, Hdv = d_keys * n_heads, d_values * n_heads
    ks = jax.random.split(key, 16)
    u = lambda k, shape, fan_in: jax.random.uniform(
        k, shape, jnp.float32, -1.0 / sqrt(fan_in), 1.0 / sqrt(fan_in))
    return {
        # weights stored (in_features, out_features) so kernels do x @ W
        "wq1": u(ks[0], (d_model, Hdk), d_model), "bq1": u(ks[1], (1, Hdk), d_model),
        "wk1": u(ks[2], (d_model, Hdk), d_model), "bk1": u(ks[3], (1, Hdk), d_model),
        "wv1": u(ks[4], (d_model, Hdv), d_model), "bv1": u(ks[5], (1, Hdv), d_model),
        "wq2": u(ks[6], (d_model, Hdk), d_model), "bq2": u(ks[7], (1, Hdk), d_model),
        "wk2": u(ks[8], (d_model, Hdk), d_model), "bk2": u(ks[9], (1, Hdk), d_model),
        "wv2": u(ks[10], (d_model, Hdv), d_model), "bv2": u(ks[11], (1, Hdv), d_model),
        "wo1": u(ks[12], (Hdv, d_model), Hdv), "bo1": u(ks[13], (1, d_model), Hdv),
        # out_projection2 is unused in the module's forward; kept for parity.
        "wo2": u(ks[14], (Hdv, d_model), Hdv), "bo2": u(ks[15], (1, d_model), Hdv),
    }


if __name__ == "__main__":
    B, L, S, d_model, n_heads = 2, 8, 8, 32, 4

    key = jax.random.PRNGKey(0)
    kq1, kk1, kv1, kq2, kk2, kv2, kp = jax.random.split(key, 7)
    q1 = jax.random.normal(kq1, (B, L, d_model), jnp.float32)
    k1 = jax.random.normal(kk1, (B, S, d_model), jnp.float32)
    v1 = jax.random.normal(kv1, (B, S, d_model), jnp.float32)
    q2 = jax.random.normal(kq2, (B, L, d_model), jnp.float32)
    k2 = jax.random.normal(kk2, (B, S, d_model), jnp.float32)
    v2 = jax.random.normal(kv2, (B, S, d_model), jnp.float32)
    params = init_params(kp, d_model, n_heads)

    out, attn = attention_layer3_pallas(
        q1, k1, v1, q2, k2, v2, params, n_heads=n_heads, attn_mask=None)
    out = jax.block_until_ready(out)
    attn = jax.block_until_ready(attn)

    out_ref, attn_ref = attention_layer3_ref(
        q1, k1, v1, q2, k2, v2, params, n_heads=n_heads)

    assert out.shape == (B, L, d_model)
    assert attn.shape == (B, n_heads, L, S)
    # bf16 MXU operands (f32 accumulation) + approx reciprocal -> loose tolerance.
    assert jnp.allclose(out, out_ref, atol=3e-2, rtol=3e-2), \
        float(jnp.max(jnp.abs(out - out_ref)))
    assert jnp.allclose(attn.astype(jnp.float32), attn_ref, atol=2e-2, rtol=2e-2), \
        float(jnp.max(jnp.abs(attn.astype(jnp.float32) - attn_ref)))

    # Fast path without the (B, H, L, S) attention write-back.
    out2, _ = attention_layer3_pallas(
        q1, k1, v1, q2, k2, v2, params, n_heads=n_heads, attn_mask=None,
        return_attn=False)
    out2 = jax.block_until_ready(out2)
    assert jnp.allclose(out2, out_ref, atol=3e-2, rtol=3e-2)

    # Multi-L-tile path (exercises the pl.when K/V-projection caching).
    out3, attn3 = attention_layer3_pallas(
        q1, k1, v1, q2, k2, v2, params, n_heads=n_heads, attn_mask=None, tile_l=4)
    out3 = jax.block_until_ready(out3)
    assert jnp.allclose(out3, out_ref, atol=3e-2, rtol=3e-2)
    assert jnp.allclose(attn3.astype(jnp.float32), attn_ref, atol=2e-2, rtol=2e-2)

    print("KERNEL_OK")
</pallas_src>

<mosaic_0001>
module attributes {stable_mosaic.version = 11 : i64} {
  func.func @_attention_layer3_kernel(%arg0: i32, %arg1: i32, %arg2: memref<1x8x32xbf16, #tpu.memory_space<vmem>>, %arg3: memref<1x8x32xbf16, #tpu.memory_space<vmem>>, %arg4: memref<1x8x32xbf16, #tpu.memory_space<vmem>>, %arg5: memref<1x8x32xbf16, #tpu.memory_space<vmem>>, %arg6: memref<1x8x32xbf16, #tpu.memory_space<vmem>>, %arg7: memref<32x32xbf16, #tpu.memory_space<vmem>>, %arg8: memref<1x32xf32, #tpu.memory_space<vmem>>, %arg9: memref<32x32xbf16, #tpu.memory_space<vmem>>, %arg10: memref<1x32xf32, #tpu.memory_space<vmem>>, %arg11: memref<32x32xbf16, #tpu.memory_space<vmem>>, %arg12: memref<1x32xf32, #tpu.memory_space<vmem>>, %arg13: memref<32x32xbf16, #tpu.memory_space<vmem>>, %arg14: memref<1x32xf32, #tpu.memory_space<vmem>>, %arg15: memref<32x32xbf16, #tpu.memory_space<vmem>>, %arg16: memref<1x32xf32, #tpu.memory_space<vmem>>, %arg17: memref<32x32xbf16, #tpu.memory_space<vmem>>, %arg18: memref<1x32xf32, #tpu.memory_space<vmem>>, %arg19: memref<1x8x32xf32, #tpu.memory_space<vmem>>, %arg20: memref<1x4x8x8xbf16, #tpu.memory_space<vmem>>, %arg21: memref<8x64xbf16, #tpu.memory_space<vmem>>, %arg22: memref<8x32xbf16, #tpu.memory_space<vmem>>) attributes {dimension_semantics = [#tpu.dimension_semantics<parallel>, #tpu.dimension_semantics<arbitrary>], iteration_bounds = array<i64: 2, 1>, scalar_prefetch = 0 : i64, scratch_operands = 2 : i64, tpu.core_type = #tpu.core_type<tc>, window_params = [{transform_indices = @transform_0, window_bounds = array<i64: 1, 8, 32>}, {transform_indices = @transform_1, window_bounds = array<i64: 1, 8, 32>}, {transform_indices = @transform_2, window_bounds = array<i64: 1, 8, 32>}, {transform_indices = @transform_3, window_bounds = array<i64: 1, 8, 32>}, {transform_indices = @transform_4, window_bounds = array<i64: 1, 8, 32>}, {pipeline_mode = #tpu.pipeline_mode<synchronous>, transform_indices = @transform_5, window_bounds = array<i64: 32, 32>}, {pipeline_mode = #tpu.pipeline_mode<synchronous>, transform_indices = @transform_6, window_bounds = array<i64: 1, 32>}, {pipeline_mode = #tpu.pipeline_mode<synchronous>, transform_indices = @transform_7, window_bounds = array<i64: 32, 32>}, {pipeline_mode = #tpu.pipeline_mode<synchronous>, transform_indices = @transform_8, window_bounds = array<i64: 1, 32>}, {pipeline_mode = #tpu.pipeline_mode<synchronous>, transform_indices = @transform_9, window_bounds = array<i64: 32, 32>}, {pipeline_mode = #tpu.pipeline_mode<synchronous>, transform_indices = @transform_10, window_bounds = array<i64: 1, 32>}, {pipeline_mode = #tpu.pipeline_mode<synchronous>, transform_indices = @transform_11, window_bounds = array<i64: 32, 32>}, {pipeline_mode = #tpu.pipeline_mode<synchronous>, transform_indices = @transform_12, window_bounds = array<i64: 1, 32>}, {pipeline_mode = #tpu.pipeline_mode<synchronous>, transform_indices = @transform_13, window_bounds = array<i64: 32, 32>}, {pipeline_mode = #tpu.pipeline_mode<synchronous>, transform_indices = @transform_14, window_bounds = array<i64: 1, 32>}, {pipeline_mode = #tpu.pipeline_mode<synchronous>, transform_indices = @transform_15, window_bounds = array<i64: 32, 32>}, {pipeline_mode = #tpu.pipeline_mode<synchronous>, transform_indices = @transform_16, window_bounds = array<i64: 1, 32>}, {transform_indices = @transform_17, window_bounds = array<i64: 1, 8, 32>}, {transform_indices = @transform_18, window_bounds = array<i64: 1, 4, 8, 8>}]} {
    %c0_i32 = arith.constant 0 : i32
    %0 = arith.cmpi eq, %arg1, %c0_i32 : i32
    %1 = arith.extui %0 : i1 to i32
    %c0_i32_0 = arith.constant 0 : i32
    %2 = arith.cmpi ne, %1, %c0_i32_0 : i32
    scf.if %2 {
      %c0_58 = arith.constant 0 : index
      %c0_59 = arith.constant 0 : index
      %c0_60 = arith.constant 0 : index
      %127 = vector.load %arg3[%c0_58, %c0_59, %c0_60] : memref<1x8x32xbf16, #tpu.memory_space<vmem>>, vector<1x8x32xbf16>
      %128 = vector.shape_cast %127 : vector<1x8x32xbf16> to vector<8x32xbf16>
      %c0_61 = arith.constant 0 : index
      %c0_62 = arith.constant 0 : index
      %c0_63 = arith.constant 0 : index
      %129 = vector.load %arg6[%c0_61, %c0_62, %c0_63] : memref<1x8x32xbf16, #tpu.memory_space<vmem>>, vector<1x8x32xbf16>
      %130 = vector.shape_cast %129 : vector<1x8x32xbf16> to vector<8x32xbf16>
      %c0_64 = arith.constant 0 : index
      %c0_65 = arith.constant 0 : index
      %c0_66 = arith.constant 0 : index
      %131 = vector.load %arg4[%c0_64, %c0_65, %c0_66] : memref<1x8x32xbf16, #tpu.memory_space<vmem>>, vector<1x8x32xbf16>
      %132 = vector.shape_cast %131 : vector<1x8x32xbf16> to vector<8x32xbf16>
      %c0_67 = arith.constant 0 : index
      %c0_68 = arith.constant 0 : index
      %133 = vector.load %arg9[%c0_67, %c0_68] : memref<32x32xbf16, #tpu.memory_space<vmem>>, vector<32x32xbf16>
      %cst_69 = arith.constant dense<0.000000e+00> : vector<8x32xf32>
      %134 = tpu.matmul %128, %133, %cst_69 {dimension_numbers = #tpu.dot_dimension_numbers<[1], [0], [0], [1], [0, 0, 1, 1], [], []>} : vector<8x32xbf16>, vector<32x32xbf16>, vector<8x32xf32> -> vector<8x32xf32>
      %c0_70 = arith.constant 0 : index
      %c0_71 = arith.constant 0 : index
      %135 = vector.load %arg10[%c0_70, %c0_71] : memref<1x32xf32, #tpu.memory_space<vmem>>, vector<1x32xf32>
      %136 = vector.broadcast %135 : vector<1x32xf32> to vector<8x32xf32>
      %137 = arith.addf %134, %136 : vector<8x32xf32>
      %138 = arith.truncf %137 : vector<8x32xf32> to vector<8x32xbf16>
      %c0_72 = arith.constant 0 : index
      %c0_73 = arith.constant 0 : index
      %139 = vector.load %arg15[%c0_72, %c0_73] : memref<32x32xbf16, #tpu.memory_space<vmem>>, vector<32x32xbf16>
      %cst_74 = arith.constant dense<0.000000e+00> : vector<8x32xf32>
      %140 = tpu.matmul %130, %139, %cst_74 {dimension_numbers = #tpu.dot_dimension_numbers<[1], [0], [0], [1], [0, 0, 1, 1], [], []>} : vector<8x32xbf16>, vector<32x32xbf16>, vector<8x32xf32> -> vector<8x32xf32>
      %c0_75 = arith.constant 0 : index
      %c0_76 = arith.constant 0 : index
      %141 = vector.load %arg16[%c0_75, %c0_76] : memref<1x32xf32, #tpu.memory_space<vmem>>, vector<1x32xf32>
      %142 = vector.broadcast %141 : vector<1x32xf32> to vector<8x32xf32>
      %143 = arith.addf %140, %142 : vector<8x32xf32>
      %144 = arith.truncf %143 : vector<8x32xf32> to vector<8x32xbf16>
      %145 = vector.extract_strided_slice %138 {offsets = [0, 0], sizes = [8, 8], strides = [1, 1]} : vector<8x32xbf16> to vector<8x8xbf16>
      %146 = vector.extract_strided_slice %144 {offsets = [0, 0], sizes = [8, 8], strides = [1, 1]} : vector<8x32xbf16> to vector<8x8xbf16>
      %147 = vector.extract_strided_slice %138 {offsets = [0, 8], sizes = [8, 8], strides = [1, 1]} : vector<8x32xbf16> to vector<8x8xbf16>
      %148 = vector.extract_strided_slice %144 {offsets = [0, 8], sizes = [8, 8], strides = [1, 1]} : vector<8x32xbf16> to vector<8x8xbf16>
      %149 = vector.extract_strided_slice %138 {offsets = [0, 16], sizes = [8, 8], strides = [1, 1]} : vector<8x32xbf16> to vector<8x8xbf16>
      %150 = vector.extract_strided_slice %144 {offsets = [0, 16], sizes = [8, 8], strides = [1, 1]} : vector<8x32xbf16> to vector<8x8xbf16>
      %151 = vector.extract_strided_slice %138 {offsets = [0, 24], sizes = [8, 8], strides = [1, 1]} : vector<8x32xbf16> to vector<8x8xbf16>
      %152 = vector.extract_strided_slice %144 {offsets = [0, 24], sizes = [8, 8], strides = [1, 1]} : vector<8x32xbf16> to vector<8x8xbf16>
      %153 = tpu.concatenate %145, %146, %147, %148, %149, %150, %151, %152 in 1 : vector<8x8xbf16>, vector<8x8xbf16>, vector<8x8xbf16>, vector<8x8xbf16>, vector<8x8xbf16>, vector<8x8xbf16>, vector<8x8xbf16>, vector<8x8xbf16> -> vector<8x64xbf16>
      %c0_77 = arith.constant 0 : index
      %c0_78 = arith.constant 0 : index
      %154 = vector.load %arg21[%c0_77, %c0_78] : memref<8x64xbf16, #tpu.memory_space<vmem>>, vector<8x64xbf16>
      tpu.vector_store %arg21[%c0_77, %c0_78], %153 {strides = array<i32>} : memref<8x64xbf16, #tpu.memory_space<vmem>>, vector<8x64xbf16>,
      %c0_79 = arith.constant 0 : index
      %c0_80 = arith.constant 0 : index
      %155 = vector.load %arg11[%c0_79, %c0_80] : memref<32x32xbf16, #tpu.memory_space<vmem>>, vector<32x32xbf16>
      %cst_81 = arith.constant dense<0.000000e+00> : vector<8x32xf32>
      %156 = tpu.matmul %132, %155, %cst_81 {dimension_numbers = #tpu.dot_dimension_numbers<[1], [0], [0], [1], [0, 0, 1, 1], [], []>} : vector<8x32xbf16>, vector<32x32xbf16>, vector<8x32xf32> -> vector<8x32xf32>
      %c0_82 = arith.constant 0 : index
      %c0_83 = arith.constant 0 : index
      %157 = vector.load %arg12[%c0_82, %c0_83] : memref<1x32xf32, #tpu.memory_space<vmem>>, vector<1x32xf32>
      %158 = vector.broadcast %157 : vector<1x32xf32> to vector<8x32xf32>
      %159 = arith.addf %156, %158 : vector<8x32xf32>
      %160 = arith.truncf %159 : vector<8x32xf32> to vector<8x32xbf16>
      %c0_84 = arith.constant 0 : index
      %c0_85 = arith.constant 0 : index
      %161 = vector.load %arg22[%c0_84, %c0_85] : memref<8x32xbf16, #tpu.memory_space<vmem>>, vector<8x32xbf16>
      tpu.vector_store %arg22[%c0_84, %c0_85], %160 {strides = array<i32>} : memref<8x32xbf16, #tpu.memory_space<vmem>>, vector<8x32xbf16>,
    } else {
    }
    %c0 = arith.constant 0 : index
    %c0_1 = arith.constant 0 : index
    %c0_2 = arith.constant 0 : index
    %3 = vector.load %arg2[%c0, %c0_1, %c0_2] : memref<1x8x32xbf16, #tpu.memory_space<vmem>>, vector<1x8x32xbf16>
    %4 = vector.shape_cast %3 : vector<1x8x32xbf16> to vector<8x32xbf16>
    %c0_3 = arith.constant 0 : index
    %c0_4 = arith.constant 0 : index
    %c0_5 = arith.constant 0 : index
    %5 = vector.load %arg5[%c0_3, %c0_4, %c0_5] : memref<1x8x32xbf16, #tpu.memory_space<vmem>>, vector<1x8x32xbf16>
    %6 = vector.shape_cast %5 : vector<1x8x32xbf16> to vector<8x32xbf16>
    %c0_6 = arith.constant 0 : index
    %c0_7 = arith.constant 0 : index
    %7 = vector.load %arg7[%c0_6, %c0_7] : memref<32x32xbf16, #tpu.memory_space<vmem>>, vector<32x32xbf16>
    %cst = arith.constant dense<0.000000e+00> : vector<8x32xf32>
    %8 = tpu.matmul %4, %7, %cst {dimension_numbers = #tpu.dot_dimension_numbers<[1], [0], [0], [1], [0, 0, 1, 1], [], []>} : vector<8x32xbf16>, vector<32x32xbf16>, vector<8x32xf32> -> vector<8x32xf32>
    %c0_8 = arith.constant 0 : index
    %c0_9 = arith.constant 0 : index
    %9 = vector.load %arg8[%c0_8, %c0_9] : memref<1x32xf32, #tpu.memory_space<vmem>>, vector<1x32xf32>
    %10 = vector.broadcast %9 : vector<1x32xf32> to vector<8x32xf32>
    %11 = arith.addf %8, %10 : vector<8x32xf32>
    %cst_10 = arith.constant 0.353553385 : f32
    %12 = vector.broadcast %cst_10 : f32 to vector<8x32xf32>
    %13 = arith.mulf %11, %12 : vector<8x32xf32>
    %14 = arith.truncf %13 : vector<8x32xf32> to vector<8x32xbf16>
    %c0_11 = arith.constant 0 : index
    %c0_12 = arith.constant 0 : index
    %15 = vector.load %arg13[%c0_11, %c0_12] : memref<32x32xbf16, #tpu.memory_space<vmem>>, vector<32x32xbf16>
    %cst_13 = arith.constant dense<0.000000e+00> : vector<8x32xf32>
    %16 = tpu.matmul %6, %15, %cst_13 {dimension_numbers = #tpu.dot_dimension_numbers<[1], [0], [0], [1], [0, 0, 1, 1], [], []>} : vector<8x32xbf16>, vector<32x32xbf16>, vector<8x32xf32> -> vector<8x32xf32>
    %c0_14 = arith.constant 0 : index
    %c0_15 = arith.constant 0 : index
    %17 = vector.load %arg14[%c0_14, %c0_15] : memref<1x32xf32, #tpu.memory_space<vmem>>, vector<1x32xf32>
    %18 = vector.broadcast %17 : vector<1x32xf32> to vector<8x32xf32>
    %19 = arith.addf %16, %18 : vector<8x32xf32>
    %cst_16 = arith.constant 0.353553385 : f32
    %20 = vector.broadcast %cst_16 : f32 to vector<8x32xf32>
    %21 = arith.mulf %19, %20 : vector<8x32xf32>
    %22 = arith.truncf %21 : vector<8x32xf32> to vector<8x32xbf16>
    %23 = vector.extract_strided_slice %14 {offsets = [0, 0], sizes = [8, 8], strides = [1, 1]} : vector<8x32xbf16> to vector<8x8xbf16>
    %24 = vector.extract_strided_slice %22 {offsets = [0, 0], sizes = [8, 8], strides = [1, 1]} : vector<8x32xbf16> to vector<8x8xbf16>
    %25 = vector.extract_strided_slice %14 {offsets = [0, 8], sizes = [8, 8], strides = [1, 1]} : vector<8x32xbf16> to vector<8x8xbf16>
    %26 = vector.extract_strided_slice %22 {offsets = [0, 8], sizes = [8, 8], strides = [1, 1]} : vector<8x32xbf16> to vector<8x8xbf16>
    %27 = vector.extract_strided_slice %14 {offsets = [0, 16], sizes = [8, 8], strides = [1, 1]} : vector<8x32xbf16> to vector<8x8xbf16>
    %28 = vector.extract_strided_slice %22 {offsets = [0, 16], sizes = [8, 8], strides = [1, 1]} : vector<8x32xbf16> to vector<8x8xbf16>
    %29 = vector.extract_strided_slice %14 {offsets = [0, 24], sizes = [8, 8], strides = [1, 1]} : vector<8x32xbf16> to vector<8x8xbf16>
    %30 = vector.extract_strided_slice %22 {offsets = [0, 24], sizes = [8, 8], strides = [1, 1]} : vector<8x32xbf16> to vector<8x8xbf16>
    %31 = tpu.concatenate %23, %24, %25, %26, %27, %28, %29, %30 in 1 : vector<8x8xbf16>, vector<8x8xbf16>, vector<8x8xbf16>, vector<8x8xbf16>, vector<8x8xbf16>, vector<8x8xbf16>, vector<8x8xbf16>, vector<8x8xbf16> -> vector<8x64xbf16>
    %c0_17 = arith.constant 0 : index
    %c0_18 = arith.constant 0 : index
    %32 = vector.load %arg21[%c0_17, %c0_18] : memref<8x64xbf16, #tpu.memory_space<vmem>>, vector<8x64xbf16>
    %c0_19 = arith.constant 0 : index
    %c0_20 = arith.constant 0 : index
    %33 = vector.load %arg22[%c0_19, %c0_20] : memref<8x32xbf16, #tpu.memory_space<vmem>>, vector<8x32xbf16>
    %34 = vector.extract_strided_slice %31 {offsets = [0, 0], sizes = [8, 16], strides = [1, 1]} : vector<8x64xbf16> to vector<8x16xbf16>
    %35 = vector.extract_strided_slice %32 {offsets = [0, 0], sizes = [8, 16], strides = [1, 1]} : vector<8x64xbf16> to vector<8x16xbf16>
    %cst_21 = arith.constant dense<0.000000e+00> : vector<8x8xf32>
    %36 = tpu.matmul %34, %35, %cst_21 {dimension_numbers = #tpu.dot_dimension_numbers<[1], [1], [0], [0], [0, 0, 1, 0], [], []>} : vector<8x16xbf16>, vector<8x16xbf16>, vector<8x8xf32> -> vector<8x8xf32>
    %cst_22 = arith.constant dense<0xFF800000> : vector<8xf32>
    %37 = vector.multi_reduction <maximumf>, %36, %cst_22 [1] : vector<8x8xf32> to vector<8xf32>
    %38 = vector.shape_cast %37 : vector<8xf32> to vector<8x1xf32>
    %39 = vector.broadcast %38 : vector<8x1xf32> to vector<8x8xf32>
    %40 = arith.subf %36, %39 : vector<8x8xf32>
    %41 = math.exp %40 : vector<8x8xf32>
    %cst_23 = arith.constant dense<0.000000e+00> : vector<8xf32>
    %42 = vector.multi_reduction <add>, %41, %cst_23 [1] : vector<8x8xf32> to vector<8xf32>
    %43 = vector.shape_cast %42 : vector<8xf32> to vector<8x1xf32>
    %44 = tpu.reciprocal %43 {approx = true} : vector<8x1xf32> -> vector<8x1xf32>
    %45 = vector.broadcast %44 : vector<8x1xf32> to vector<8x8xf32>
    %46 = arith.mulf %41, %45 : vector<8x8xf32>
    %47 = arith.truncf %46 : vector<8x8xf32> to vector<8x8xbf16>
    %c0_24 = arith.constant 0 : index
    %c0_25 = arith.constant 0 : index
    %c0_26 = arith.constant 0 : index
    %c0_27 = arith.constant 0 : index
    %48 = vector.load %arg20[%c0_24, %c0_25, %c0_26, %c0_27] : memref<1x4x8x8xbf16, #tpu.memory_space<vmem>>, vector<1x1x8x8xbf16>
    %49 = vector.shape_cast %48 : vector<1x1x8x8xbf16> to vector<8x8xbf16>
    %50 = vector.shape_cast %47 : vector<8x8xbf16> to vector<1x1x8x8xbf16>
    tpu.vector_store %arg20[%c0_24, %c0_25, %c0_26, %c0_27], %50 {strides = array<i32>} : memref<1x4x8x8xbf16, #tpu.memory_space<vmem>>, vector<1x1x8x8xbf16>,
    %51 = vector.extract_strided_slice %33 {offsets = [0, 0], sizes = [8, 8], strides = [1, 1]} : vector<8x32xbf16> to vector<8x8xbf16>
    %52 = arith.truncf %46 : vector<8x8xf32> to vector<8x8xbf16>
    %cst_28 = arith.constant dense<0.000000e+00> : vector<8x8xf32>
    %53 = tpu.matmul %52, %51, %cst_28 {dimension_numbers = #tpu.dot_dimension_numbers<[1], [0], [0], [1], [0, 0, 1, 1], [], []>} : vector<8x8xbf16>, vector<8x8xbf16>, vector<8x8xf32> -> vector<8x8xf32>
    %54 = arith.truncf %53 : vector<8x8xf32> to vector<8x8xbf16>
    %55 = vector.extract_strided_slice %31 {offsets = [0, 16], sizes = [8, 16], strides = [1, 1]} : vector<8x64xbf16> to vector<8x16xbf16>
    %56 = vector.extract_strided_slice %32 {offsets = [0, 16], sizes = [8, 16], strides = [1, 1]} : vector<8x64xbf16> to vector<8x16xbf16>
    %cst_29 = arith.constant dense<0.000000e+00> : vector<8x8xf32>
    %57 = tpu.matmul %55, %56, %cst_29 {dimension_numbers = #tpu.dot_dimension_numbers<[1], [1], [0], [0], [0, 0, 1, 0], [], []>} : vector<8x16xbf16>, vector<8x16xbf16>, vector<8x8xf32> -> vector<8x8xf32>
    %cst_30 = arith.constant dense<0xFF800000> : vector<8xf32>
    %58 = vector.multi_reduction <maximumf>, %57, %cst_30 [1] : vector<8x8xf32> to vector<8xf32>
    %59 = vector.shape_cast %58 : vector<8xf32> to vector<8x1xf32>
    %60 = vector.broadcast %59 : vector<8x1xf32> to vector<8x8xf32>
    %61 = arith.subf %57, %60 : vector<8x8xf32>
    %62 = math.exp %61 : vector<8x8xf32>
    %cst_31 = arith.constant dense<0.000000e+00> : vector<8xf32>
    %63 = vector.multi_reduction <add>, %62, %cst_31 [1] : vector<8x8xf32> to vector<8xf32>
    %64 = vector.shape_cast %63 : vector<8xf32> to vector<8x1xf32>
    %65 = tpu.reciprocal %64 {approx = true} : vector<8x1xf32> -> vector<8x1xf32>
    %66 = vector.broadcast %65 : vector<8x1xf32> to vector<8x8xf32>
    %67 = arith.mulf %62, %66 : vector<8x8xf32>
    %68 = arith.truncf %67 : vector<8x8xf32> to vector<8x8xbf16>
    %c0_32 = arith.constant 0 : index
    %c1 = arith.constant 1 : index
    %c0_33 = arith.constant 0 : index
    %c0_34 = arith.constant 0 : index
    %69 = vector.load %arg20[%c0_32, %c1, %c0_33, %c0_34] : memref<1x4x8x8xbf16, #tpu.memory_space<vmem>>, vector<1x1x8x8xbf16>
    %70 = vector.shape_cast %69 : vector<1x1x8x8xbf16> to vector<8x8xbf16>
    %71 = vector.shape_cast %68 : vector<8x8xbf16> to vector<1x1x8x8xbf16>
    tpu.vector_store %arg20[%c0_32, %c1, %c0_33, %c0_34], %71 {strides = array<i32>} : memref<1x4x8x8xbf16, #tpu.memory_space<vmem>>, vector<1x1x8x8xbf16>,
    %72 = vector.extract_strided_slice %33 {offsets = [0, 8], sizes = [8, 8], strides = [1, 1]} : vector<8x32xbf16> to vector<8x8xbf16>
    %73 = arith.truncf %67 : vector<8x8xf32> to vector<8x8xbf16>
    %cst_35 = arith.constant dense<0.000000e+00> : vector<8x8xf32>
    %74 = tpu.matmul %73, %72, %cst_35 {dimension_numbers = #tpu.dot_dimension_numbers<[1], [0], [0], [1], [0, 0, 1, 1], [], []>} : vector<8x8xbf16>, vector<8x8xbf16>, vector<8x8xf32> -> vector<8x8xf32>
    %75 = arith.truncf %74 : vector<8x8xf32> to vector<8x8xbf16>
    %76 = vector.extract_strided_slice %31 {offsets = [0, 32], sizes = [8, 16], strides = [1, 1]} : vector<8x64xbf16> to vector<8x16xbf16>
    %77 = vector.extract_strided_slice %32 {offsets = [0, 32], sizes = [8, 16], strides = [1, 1]} : vector<8x64xbf16> to vector<8x16xbf16>
    %cst_36 = arith.constant dense<0.000000e+00> : vector<8x8xf32>
    %78 = tpu.matmul %76, %77, %cst_36 {dimension_numbers = #tpu.dot_dimension_numbers<[1], [1], [0], [0], [0, 0, 1, 0], [], []>} : vector<8x16xbf16>, vector<8x16xbf16>, vector<8x8xf32> -> vector<8x8xf32>
    %cst_37 = arith.constant dense<0xFF800000> : vector<8xf32>
    %79 = vector.multi_reduction <maximumf>, %78, %cst_37 [1] : vector<8x8xf32> to vector<8xf32>
    %80 = vector.shape_cast %79 : vector<8xf32> to vector<8x1xf32>
    %81 = vector.broadcast %80 : vector<8x1xf32> to vector<8x8xf32>
    %82 = arith.subf %78, %81 : vector<8x8xf32>
    %83 = math.exp %82 : vector<8x8xf32>
    %cst_38 = arith.constant dense<0.000000e+00> : vector<8xf32>
    %84 = vector.multi_reduction <add>, %83, %cst_38 [1] : vector<8x8xf32> to vector<8xf32>
    %85 = vector.shape_cast %84 : vector<8xf32> to vector<8x1xf32>
    %86 = tpu.reciprocal %85 {approx = true} : vector<8x1xf32> -> vector<8x1xf32>
    %87 = vector.broadcast %86 : vector<8x1xf32> to vector<8x8xf32>
    %88 = arith.mulf %83, %87 : vector<8x8xf32>
    %89 = arith.truncf %88 : vector<8x8xf32> to vector<8x8xbf16>
    %c0_39 = arith.constant 0 : index
    %c2 = arith.constant 2 : index
    %c0_40 = arith.constant 0 : index
    %c0_41 = arith.constant 0 : index
    %90 = vector.load %arg20[%c0_39, %c2, %c0_40, %c0_41] : memref<1x4x8x8xbf16, #tpu.memory_space<vmem>>, vector<1x1x8x8xbf16>
    %91 = vector.shape_cast %90 : vector<1x1x8x8xbf16> to vector<8x8xbf16>
    %92 = vector.shape_cast %89 : vector<8x8xbf16> to vector<1x1x8x8xbf16>
    tpu.vector_store %arg20[%c0_39, %c2, %c0_40, %c0_41], %92 {strides = array<i32>} : memref<1x4x8x8xbf16, #tpu.memory_space<vmem>>, vector<1x1x8x8xbf16>,
    %93 = vector.extract_strided_slice %33 {offsets = [0, 16], sizes = [8, 8], strides = [1, 1]} : vector<8x32xbf16> to vector<8x8xbf16>
    %94 = arith.truncf %88 : vector<8x8xf32> to vector<8x8xbf16>
    %cst_42 = arith.constant dense<0.000000e+00> : vector<8x8xf32>
    %95 = tpu.matmul %94, %93, %cst_42 {dimension_numbers = #tpu.dot_dimension_numbers<[1], [0], [0], [1], [0, 0, 1, 1], [], []>} : vector<8x8xbf16>, vector<8x8xbf16>, vector<8x8xf32> -> vector<8x8xf32>
    %96 = arith.truncf %95 : vector<8x8xf32> to vector<8x8xbf16>
    %97 = vector.extract_strided_slice %31 {offsets = [0, 48], sizes = [8, 16], strides = [1, 1]} : vector<8x64xbf16> to vector<8x16xbf16>
    %98 = vector.extract_strided_slice %32 {offsets = [0, 48], sizes = [8, 16], strides = [1, 1]} : vector<8x64xbf16> to vector<8x16xbf16>
    %cst_43 = arith.constant dense<0.000000e+00> : vector<8x8xf32>
    %99 = tpu.matmul %97, %98, %cst_43 {dimension_numbers = #tpu.dot_dimension_numbers<[1], [1], [0], [0], [0, 0, 1, 0], [], []>} : vector<8x16xbf16>, vector<8x16xbf16>, vector<8x8xf32> -> vector<8x8xf32>
    %cst_44 = arith.constant dense<0xFF800000> : vector<8xf32>
    %100 = vector.multi_reduction <maximumf>, %99, %cst_44 [1] : vector<8x8xf32> to vector<8xf32>
    %101 = vector.shape_cast %100 : vector<8xf32> to vector<8x1xf32>
    %102 = vector.broadcast %101 : vector<8x1xf32> to vector<8x8xf32>
    %103 = arith.subf %99, %102 : vector<8x8xf32>
    %104 = math.exp %103 : vector<8x8xf32>
    %cst_45 = arith.constant dense<0.000000e+00> : vector<8xf32>
    %105 = vector.multi_reduction <add>, %104, %cst_45 [1] : vector<8x8xf32> to vector<8xf32>
    %106 = vector.shape_cast %105 : vector<8xf32> to vector<8x1xf32>
    %107 = tpu.reciprocal %106 {approx = true} : vector<8x1xf32> -> vector<8x1xf32>
    %108 = vector.broadcast %107 : vector<8x1xf32> to vector<8x8xf32>
    %109 = arith.mulf %104, %108 : vector<8x8xf32>
    %110 = arith.truncf %109 : vector<8x8xf32> to vector<8x8xbf16>
    %c0_46 = arith.constant 0 : index
    %c3 = arith.constant 3 : index
    %c0_47 = arith.constant 0 : index
    %c0_48 = arith.constant 0 : index
    %111 = vector.load %arg20[%c0_46, %c3, %c0_47, %c0_48] : memref<1x4x8x8xbf16, #tpu.memory_space<vmem>>, vector<1x1x8x8xbf16>
    %112 = vector.shape_cast %111 : vector<1x1x8x8xbf16> to vector<8x8xbf16>
    %113 = vector.shape_cast %110 : vector<8x8xbf16> to vector<1x1x8x8xbf16>
    tpu.vector_store %arg20[%c0_46, %c3, %c0_47, %c0_48], %113 {strides = array<i32>} : memref<1x4x8x8xbf16, #tpu.memory_space<vmem>>, vector<1x1x8x8xbf16>,
    %114 = vector.extract_strided_slice %33 {offsets = [0, 24], sizes = [8, 8], strides = [1, 1]} : vector<8x32xbf16> to vector<8x8xbf16>
    %115 = arith.truncf %109 : vector<8x8xf32> to vector<8x8xbf16>
    %cst_49 = arith.constant dense<0.000000e+00> : vector<8x8xf32>
    %116 = tpu.matmul %115, %114, %cst_49 {dimension_numbers = #tpu.dot_dimension_numbers<[1], [0], [0], [1], [0, 0, 1, 1], [], []>} : vector<8x8xbf16>, vector<8x8xbf16>, vector<8x8xf32> -> vector<8x8xf32>
    %117 = arith.truncf %116 : vector<8x8xf32> to vector<8x8xbf16>
    %118 = tpu.concatenate %54, %75, %96, %117 in 1 : vector<8x8xbf16>, vector<8x8xbf16>, vector<8x8xbf16>, vector<8x8xbf16> -> vector<8x32xbf16>
    %c0_50 = arith.constant 0 : index
    %c0_51 = arith.constant 0 : index
    %119 = vector.load %arg17[%c0_50, %c0_51] : memref<32x32xbf16, #tpu.memory_space<vmem>>, vector<32x32xbf16>
    %cst_52 = arith.constant dense<0.000000e+00> : vector<8x32xf32>
    %120 = tpu.matmul %118, %119, %cst_52 {dimension_numbers = #tpu.dot_dimension_numbers<[1], [0], [0], [1], [0, 0, 1, 1], [], []>} : vector<8x32xbf16>, vector<32x32xbf16>, vector<8x32xf32> -> vector<8x32xf32>
    %c0_53 = arith.constant 0 : index
    %c0_54 = arith.constant 0 : index
    %121 = vector.load %arg18[%c0_53, %c0_54] : memref<1x32xf32, #tpu.memory_space<vmem>>, vector<1x32xf32>
    %122 = vector.broadcast %121 : vector<1x32xf32> to vector<8x32xf32>
    %123 = arith.addf %120, %122 : vector<8x32xf32>
    %c0_55 = arith.constant 0 : index
    %c0_56 = arith.constant 0 : index
    %c0_57 = arith.constant 0 : index
    %124 = vector.load %arg19[%c0_55, %c0_56, %c0_57] : memref<1x8x32xf32, #tpu.memory_space<vmem>>, vector<1x8x32xf32>
    %125 = vector.shape_cast %124 : vector<1x8x32xf32> to vector<8x32xf32>
    %126 = vector.shape_cast %123 : vector<8x32xf32> to vector<1x8x32xf32>
    tpu.vector_store %arg19[%c0_55, %c0_56, %c0_57], %126 {strides = array<i32>} : memref<1x8x32xf32, #tpu.memory_space<vmem>>, vector<1x8x32xf32>,
    return
  }
  func.func @transform_0(%arg0: i32, %arg1: i32) -> (i32, i32, i32) {
    %c0_i32 = arith.constant 0 : i32
    %c0_i32_0 = arith.constant 0 : i32
    return %arg0, %arg1, %c0_i32 : i32, i32, i32
  }
  func.func @transform_1(%arg0: i32, %arg1: i32) -> (i32, i32, i32) {
    %c0_i32 = arith.constant 0 : i32
    %c0_i32_0 = arith.constant 0 : i32
    %c0_i32_1 = arith.constant 0 : i32
    return %arg0, %c0_i32, %c0_i32_0 : i32, i32, i32
  }
  func.func @transform_2(%arg0: i32, %arg1: i32) -> (i32, i32, i32) {
    %c0_i32 = arith.constant 0 : i32
    %c0_i32_0 = arith.constant 0 : i32
    %c0_i32_1 = arith.constant 0 : i32
    return %arg0, %c0_i32, %c0_i32_0 : i32, i32, i32
  }
  func.func @transform_3(%arg0: i32, %arg1: i32) -> (i32, i32, i32) {
    %c0_i32 = arith.constant 0 : i32
    %c0_i32_0 = arith.constant 0 : i32
    return %arg0, %arg1, %c0_i32 : i32, i32, i32
  }
  func.func @transform_4(%arg0: i32, %arg1: i32) -> (i32, i32, i32) {
    %c0_i32 = arith.constant 0 : i32
    %c0_i32_0 = arith.constant 0 : i32
    %c0_i32_1 = arith.constant 0 : i32
    return %arg0, %c0_i32, %c0_i32_0 : i32, i32, i32
  }
  func.func @transform_5(%arg0: i32, %arg1: i32) -> (i32, i32) {
    %c0_i32 = arith.constant 0 : i32
    %c0_i32_0 = arith.constant 0 : i32
    %c0_i32_1 = arith.constant 0 : i32
    return %c0_i32, %c0_i32_0 : i32, i32
  }
  func.func @transform_6(%arg0: i32, %arg1: i32) -> (i32, i32) {
    %c0_i32 = arith.constant 0 : i32
    %c0_i32_0 = arith.constant 0 : i32
    %c0_i32_1 = arith.constant 0 : i32
    return %c0_i32, %c0_i32_0 : i32, i32
  }
  func.func @transform_7(%arg0: i32, %arg1: i32) -> (i32, i32) {
    %c0_i32 = arith.constant 0 : i32
    %c0_i32_0 = arith.constant 0 : i32
    %c0_i32_1 = arith.constant 0 : i32
    return %c0_i32, %c0_i32_0 : i32, i32
  }
  func.func @transform_8(%arg0: i32, %arg1: i32) -> (i32, i32) {
    %c0_i32 = arith.constant 0 : i32
    %c0_i32_0 = arith.constant 0 : i32
    %c0_i32_1 = arith.constant 0 : i32
    return %c0_i32, %c0_i32_0 : i32, i32
  }
  func.func @transform_9(%arg0: i32, %arg1: i32) -> (i32, i32) {
    %c0_i32 = arith.constant 0 : i32
    %c0_i32_0 = arith.constant 0 : i32
    %c0_i32_1 = arith.constant 0 : i32
    return %c0_i32, %c0_i32_0 : i32, i32
  }
  func.func @transform_10(%arg0: i32, %arg1: i32) -> (i32, i32) {
    %c0_i32 = arith.constant 0 : i32
    %c0_i32_0 = arith.constant 0 : i32
    %c0_i32_1 = arith.constant 0 : i32
    return %c0_i32, %c0_i32_0 : i32, i32
  }
  func.func @transform_11(%arg0: i32, %arg1: i32) -> (i32, i32) {
    %c0_i32 = arith.constant 0 : i32
    %c0_i32_0 = arith.constant 0 : i32
    %c0_i32_1 = arith.constant 0 : i32
    return %c0_i32, %c0_i32_0 : i32, i32
  }
  func.func @transform_12(%arg0: i32, %arg1: i32) -> (i32, i32) {
    %c0_i32 = arith.constant 0 : i32
    %c0_i32_0 = arith.constant 0 : i32
    %c0_i32_1 = arith.constant 0 : i32
    return %c0_i32, %c0_i32_0 : i32, i32
  }
  func.func @transform_13(%arg0: i32, %arg1: i32) -> (i32, i32) {
    %c0_i32 = arith.constant 0 : i32
    %c0_i32_0 = arith.constant 0 : i32
    %c0_i32_1 = arith.constant 0 : i32
    return %c0_i32, %c0_i32_0 : i32, i32
  }
  func.func @transform_14(%arg0: i32, %arg1: i32) -> (i32, i32) {
    %c0_i32 = arith.constant 0 : i32
    %c0_i32_0 = arith.constant 0 : i32
    %c0_i32_1 = arith.constant 0 : i32
    return %c0_i32, %c0_i32_0 : i32, i32
  }
  func.func @transform_15(%arg0: i32, %arg1: i32) -> (i32, i32) {
    %c0_i32 = arith.constant 0 : i32
    %c0_i32_0 = arith.constant 0 : i32
    %c0_i32_1 = arith.constant 0 : i32
    return %c0_i32, %c0_i32_0 : i32, i32
  }
  func.func @transform_16(%arg0: i32, %arg1: i32) -> (i32, i32) {
    %c0_i32 = arith.constant 0 : i32
    %c0_i32_0 = arith.constant 0 : i32
    %c0_i32_1 = arith.constant 0 : i32
    return %c0_i32, %c0_i32_0 : i32, i32
  }
  func.func @transform_17(%arg0: i32, %arg1: i32) -> (i32, i32, i32) {
    %c0_i32 = arith.constant 0 : i32
    %c0_i32_0 = arith.constant 0 : i32
    return %arg0, %arg1, %c0_i32 : i32, i32, i32
  }
  func.func @transform_18(%arg0: i32, %arg1: i32) -> (i32, i32, i32, i32) {
    %c0_i32 = arith.constant 0 : i32
    %c0_i32_0 = arith.constant 0 : i32
    %c0_i32_1 = arith.constant 0 : i32
    return %arg0, %c0_i32, %arg1, %c0_i32_0 : i32, i32, i32, i32
  }
}

</mosaic_0001>

<bundles_post_ra>
// kernel: tpu_custom_call.1
= control target key start
LH: loop header
LB: loop body
LE: loop exit
PB: predicated region body
PF: predicated region fallthrough
CT: control target
= control target key end

     0   :  { %s3653_s0 = inlined_call_operand.hbm [shape: bf16[2,8,32], index: 0, kind: input, shape index: {}]   ;;  %s3654_s1 = inlined_call_operand.hbm [shape: bf16[2,8,32], index: 1, kind: input, shape index: {}]   ;;  %s3655_s2 = inlined_call_operand.hbm [shape: bf16[2,8,32], index: 2, kind: input, shape index: {}]   ;;  %s3656_s3 = inlined_call_operand.hbm [shape: bf16[2,8,32], index: 3, kind: input, shape index: {}]   ;;  %s3657_s4 = inlined_call_operand.hbm [shape: bf16[2,8,32], index: 4, kind: input, shape index: {}]   ;;  %s3658_s5 = inlined_call_operand.hbm [shape: bf16[32,32], index: 5, kind: input, shape index: {}]   ;;  %s3659_s6 = inlined_call_operand.hbm [shape: f32[1,32], index: 6, kind: input, shape index: {}]   ;;  %s3660_s7 = inlined_call_operand.hbm [shape: bf16[32,32], index: 7, kind: input, shape index: {}]   ;;  %s3661_s8 = inlined_call_operand.hbm [shape: f32[1,32], index: 8, kind: input, shape index: {}]   ;;  %s3662_s9 = inlined_call_operand.vmem [shape: bf16[32,32], index: 9, kind: input, shape index: {}]   ;;  %s3663_s10 = inlined_call_operand.vmem [shape: f32[1,32], index: 10, kind: input, shape index: {}]   ;;  %s3664_s11 = inlined_call_operand.hbm [shape: bf16[32,32], index: 11, kind: input, shape index: {}]   ;;  %s3665_s12 = inlined_call_operand.vmem [shape: f32[1,32], index: 12, kind: input, shape index: {}]   ;;  %s3666_s13 = inlined_call_operand.hbm [shape: bf16[32,32], index: 13, kind: input, shape index: {}]   ;;  %s3667_s14 = inlined_call_operand.vmem [shape: f32[1,32], index: 14, kind: input, shape index: {}]   ;;  %s3668_s15 = inlined_call_operand.hbm [shape: bf16[32,32], index: 15, kind: input, shape index: {}]   ;;  %s3669_s16 = inlined_call_operand.vmem [shape: f32[1,32], index: 16, kind: input, shape index: {}]   ;;  %s3670_s17 = inlined_call_operand.hbm [shape: f32[2,8,32], index: 17, kind: output, shape index: {0}]   ;;  %s3671_s18 = inlined_call_operand.hbm [shape: bf16[2,4,8,8], index: 18, kind: output, shape index: {1}]  }
   0x1   :  { %3696 = sst [smem:[#allocation44_spill]] %s3653_s0 }
   0x2   :  { %3697 = sst [smem:[#allocation45_spill]] %s3654_s1 }
   0x3   :  { %3698 = sst [smem:[#allocation46_spill]] %s3655_s2 }
   0x4   :  { %3699 = sst [smem:[#allocation47_spill]] %s3656_s3 }
   0x5   :  { %3700 = sst [smem:[#allocation48_spill]] %s3658_s5 }
   0x6   :  { %3701 = sst [smem:[#allocation49_spill]] %s3659_s6 }
   0x7   :  { %3702 = sst [smem:[#allocation50_spill]] %s3660_s7 }
   0x8   :  { %3703 = sst [smem:[#allocation51_spill]] %s3661_s8 }
   0x9   :  { %3704 = sst [smem:[#allocation52_spill]] %s3662_s9 }
   0xa   :  { %3705 = sst [smem:[#allocation53_spill]] %s3663_s10 }
   0xb   :  { %3706 = sst [smem:[#allocation54_spill]] %s3664_s11 }
   0xc   :  { %3707 = sst [smem:[#allocation55_spill]] %s3665_s12 }
   0xd   :  { %3708 = sst [smem:[#allocation56_spill]] %s3667_s14 }
   0xe   :  { %3709 = sst [smem:[#allocation57_spill]] %s3669_s16 }
   0xf   :  { %3710 = sst [smem:[#allocation58_spill]] %s3670_s17 }
  0x10   :  { %3711 = sst [smem:[#allocation59_spill]] %s3671_s18 }
  0x11   :  { %24 = vsyncpa [#allocation5], 0 }
  0x12   :  { %26 = vsyncpa [#allocation5 + $0x1], 0 }
  0x13   :  { %27 = vsyncpa [#allocation8], 0 }
  0x14   :  { %29 = vsyncpa [#allocation8 + $0x1], 0 }
  0x15   :  { %30 = vsyncpa [#allocation11], 0 }
  0x16   :  { %32 = vsyncpa [#allocation11 + $0x1], 0 }
  0x17   :  { %33 = vsyncpa [#allocation14], 0 }
  0x18   :  { %34 = vsyncpa [#allocation17], 0 }
  0x19   :  { %35 = vsyncpa [#allocation20], 0 }
  0x1a   :  { %36 = vsyncpa [#allocation23], 0 }
  0x1b   :  { %37 = vsyncpa [#allocation6], 0 }
  0x1c   :  { %39 = vsyncpa [#allocation6 + $0x1], 0 }
  0x1d   :  { %40 = vsyncpa [#allocation26], 0 }
  0x1e   :  { %42 = vsyncpa [#allocation26 + $0x1], 0  ;;  %s3129_s27 = smov 0   ;;  %s3131_s28 = smov 0  }
  0x1f   :  { %s3133_s29 = smov 0   ;;  %s3135_s30 = smov 0  }
  0x20   :  { %s3137_s0 = smov 0   ;;  %s3139_s19 = smov 0  }
  0x21 LB: > { %3712 = sst [smem:[#allocation36_spill]] %s2983_s27  ;;  %s3160_s1 = sadd.s32 4294967295, %s3003_s19   ;;  %s3003_s19 = sphi %s3139_s19, %s48_s19   ;;  %s2999_s0 = sphi %s3137_s0, %s3770_s0   ;;  %s2995_s30 = sphi %s3135_s30, %s3769_s30   ;;  %s2991_s29 = sphi %s3133_s29, %s3773_s29   ;;  %s2987_s28 = sphi %s3131_s28, %s3772_s28   ;;  %s2983_s27 = sphi %s3129_s27, %s3771_s27  }
  0x22   : > { %3713 = sst [smem:[#allocation37_spill]] %s2995_s30  ;;  %p2136_p0 = scmp.ge.s32.totalorder %s3003_s19, 1 }
  0x23   : > { %3714 = sst [smem:[#allocation38_spill]] %s2999_s0  ;;  %p3689_p1 = scmp.eq.s32.totalorder %s3160_s1, 0 }
  0x24   : > { %3715 = sst [smem:[#allocation39_spill]] %s3003_s19  ;;  %p507_p2 = scmp.lt.s32.totalorder %s3003_s19, 3 }
  0x25   : > { %s3005_s21 = smov [#allocation13]   ;;  %s3006_s23 = smov [#allocation16]  }
  0x26   : > { %p3165_p3 = pnand %p2136_p0, %p507_p2  ;;  %s519_s22 = sshll.u32 %s3005_s21, 4  ;;  %s520_s22 = int_to_ptr.vmem [resolvable:$true] %s519_s22 }
  0x27   : > { %s543_s24 = sshll.u32 %s3006_s23, 4  ;;  %s3007_s25 = smov [#allocation19]   ;;  %s544_s24 = int_to_ptr.vmem [resolvable:$true] %s543_s24 }
  0x28   : > { %s3716_s20 = scalar_select %p3165_p3, 1, 0 }
  0x29   : > { %p2387_p4 = pneg %p3165_p3  ;;  %s573_s26 = sshll.u32 %s3007_s25, 4  ;;  %s574_s26 = int_to_ptr.vmem [resolvable:$true] %s573_s26 }
  0x2a   : > { %s2558_s21 = scalar_lea.vmem %s520_s22, 256  ;;  %p2566_p11 = scmp.lt.s32.totalorder %s520_s22, %s520_s22 }
  0x2b   : > { %p3174_p6 = pnand %p2387_p4, %p3689_p1  ;;  %p2559_p8 = scmp.ne.s32.totalorder %s520_s22, %s2558_s21 }
  0x2c   : > { %p2567_p12 = scmp.lt.s32.totalorder %s2558_s21, %s2558_s21 }
  0x2d   : > { %p3180_p7 = pneg %p3174_p6 }
  0x2e   : > { %p2568_p13 = por %p2567_p12, %p2566_p11 }
  0x2f   : > { %p2561_p9 = pnand %p2559_p8, %p3180_p7 }
  0x31   : > { %p2562_p10 = pneg %p2561_p9 }
  0x33   : > { %p2569_p0 = pnand %p2568_p13, %p2562_p10 }
  0x35   : > { %2572 = shalt.err (!%p2569_p0)
}
  0x36   : > { %s3676_s23 = smov 64   ;;  %s3678_s25 = smov 4  }
  0x37   : > { %s3719_s5 = sld [smem:[#allocation48_spill]]  ;;  %s2584_s30 = scalar_lea.vmem %s544_s24, 256 }
  0x38   : > { %p2585_p2 = scmp.ne.s32.totalorder %s544_s24, %s2584_s30  ;;  %p2592_p9 = scmp.lt.s32.totalorder %s544_s24, %s544_s24 }
  0x39   : > { %p2593_p10 = scmp.lt.s32.totalorder %s2584_s30, %s2584_s30 }
  0x3a   : > { %p2587_p4 = pnand %p2585_p2, %p3180_p7 }
  0x3b   : > { %p2594_p11 = por %p2593_p10, %p2592_p9 }
  0x3c   : > { %p2588_p8 = pneg %p2587_p4 }
  0x3d   : > { %2390 = dma.hbm_to_vmem [thread:$0]  (!%p3174_p6), %s3719_s5, 256, %s520_s22, [#allocation14], %s3676_s23, %s3676_s23, %s3678_s25  }
  0x3e   : > { %p2595_p12 = pnand %p2594_p11, %p2588_p8 }
  0x40   : > { %2598 = shalt.err (!%p2595_p12)
}
  0x41   : > { %s3720_s7 = sld [smem:[#allocation50_spill]]  ;;  %s2610_s16 = scalar_lea.vmem %s574_s26, 256 }
  0x42   : > { %p2611_p13 = scmp.ne.s32.totalorder %s574_s26, %s2610_s16  ;;  %p2618_p4 = scmp.lt.s32.totalorder %s574_s26, %s574_s26 }
  0x43   : > { %p2619_p9 = scmp.lt.s32.totalorder %s2610_s16, %s2610_s16 }
  0x44   : > { %p2613_p0 = pnand %p2611_p13, %p3180_p7 }
  0x45   : > { %p2620_p8 = por %p2619_p9, %p2618_p4 }
  0x46   : > { %p2614_p2 = pneg %p2613_p0 }
  0x47   : > { %2396 = dma.hbm_to_vmem [thread:$0]  (!%p3174_p6), %s3720_s7, 256, %s544_s24, [#allocation17], %s3676_s23, %s3676_s23, %s3678_s25  }
  0x48   : > { %p2621_p10 = pnand %p2620_p8, %p2614_p2 }
  0x4a   : > { %2624 = shalt.err (!%p2621_p10)
}
  0x4b   : > { %s3721_s11 = sld [smem:[#allocation54_spill]]  ;;  %s2135_s30 = sadd.s32 4294967294, %s3003_s19  }
  0x4c   : > { %s60_s22 = sadd.s32 1, %s2999_s0  ;;  %s69_s24 = sadd.s32 1, %s2991_s29 }
  0x4d   : > { %p62_p11 = scmp.ge.s32.totalorder %s60_s22, 2  ;;  %p76_p12 = scmp.ne.s32.totalorder %s2991_s29, %s2987_s28 }
  0x4e   : > { %p77_p13 = scmp.eq.s32.totalorder %s3003_s19, 0  ;;  %p82_p0 = scmp.ne.s32.totalorder %s2987_s28, %s2983_s27 }
  0x4f   : > { %s3775_s22 = smov (%p62_p11, %s60_s22), 0  ;;  %p466_p9 = scmp.eq.s32.totalorder %s3160_s1, 1 }
  0x50   : > { %3722 = sst [smem:[#allocation40_spill]] %s3775_s22  ;;  %p3224_p2 = por %p77_p13, %p76_p12 }
  0x51   : > { %2402 = dma.hbm_to_vmem [thread:$0]  (!%p3174_p6), %s3721_s11, 256, %s574_s26, [#allocation20], %s3676_s23, %s3676_s23, %s3678_s25  }
  0x52   : > { %p3230_p4 = por %p3689_p1, %p82_p0  ;;  %s64_s16 = ssub.s32 %s2999_s0, %s3775_s22 }
  0x53   : > { %p67_p8 = scmp.eq.s32.totalorder %s64_s16, 0  ;;  %p472_p10 = scmp.eq.s32.totalorder %s2135_s30, 1 }
  0x54   : > { %s3724_s26 = scalar_select %p3230_p4, 1, 0 }
  0x55   : > { %p3237_p5 = por %p466_p9, %p76_p12  ;;  %p2439_p11 = scmp.lt.s32.totalorder %s3003_s19, 2 }
  0x56   : > { %s3243_s12 = scalar_select %p67_p8, %s2991_s29, %s69_s24  }
  0x57   : > { %s3725_s18 = scalar_select %p3237_p5, 1, 0 }
  0x58   : > { %3727 = sst [smem:[#allocation42_spill]] %s3243_s12  ;;  %p3245_p13 = por %p472_p10, %p82_p0 }
  0x59   : > { %3726 = sst [smem:[#allocation41_spill]] %s3725_s18  ;;  %s3683_s25 = sand.u32 1, %s2991_s29  }
  0x5a   : > { %s3728_s23 = scalar_select %p3245_p13, 1, 0 }
  0x5b   : > { %s3252_s5 = sshll.u32 %s3683_s25, 2  ;;  %s3255_s7 = sshll.u32 %s2999_s0, 6 }
  0x5c   : > { %3729 = sst [smem:[#allocation43_spill]] %s3728_s23  ;;  %p3259_p12 = pnand %p2439_p11, %p3224_p2 }
  0x5d   : > { %s641_s24 = sand.u32 1, %s3003_s19   ;;  %s3731_s22 = sld [smem:[#allocation45_spill]] }
  0x5e   : > { %s3730_s30 = scalar_select %p3259_p12, 1, 0 }
  0x5f   : > { %s645_s23 = scalar_lea.vmem [#allocation7], %s3252_s5  ;;  %s3269_s25 = scalar_lea.sflag [#allocation8], %s641_s24 }
  0x60   : > { %s652_s27 = sshll.u32 %s645_s23, 4  ;;  %p3273_p0 = pneg %p3259_p12  ;;  %s653_s27 = int_to_ptr.vmem [resolvable:$true] %s652_s27 }
  0x61   : > { %s2638_s21 = scalar_lea.vmem %s653_s27, 64  ;;  %s3010_s19 = smov [#allocation7]  }
  0x62   : > { %p2639_p2 = scmp.ne.s32.totalorder %s653_s27, %s2638_s21  ;;  %s2643_s18 = sshll.u32 %s3010_s19, 4  ;;  %s2644_s18 = int_to_ptr.vmem [resolvable:$false] %s2643_s18 }
  0x63   : > { %s650_s12 = scalar_lea.hbm %s3731_s22, %s3255_s7  ;;  %s2645_s11 = scalar_lea.vmem %s2644_s18, 128 }
  0x64   : > { %p2641_p9 = pnand %p2639_p2, %p3273_p0  ;;  %p2646_p10 = scmp.lt.s32.totalorder %s653_s27, %s2644_s18 }
  0x65   : > { %p2647_p11 = scmp.lt.s32.totalorder %s2645_s11, %s2638_s21 }
  0x66   : > { %p2642_p8 = pneg %p2641_p9 }
  0x67   : > { %p2648_p1 = por %p2647_p11, %p2646_p10 }
  0x69   : > { %p2649_p13 = pnand %p2648_p1, %p2642_p8 }
  0x6b   : > { %2652 = shalt.err (!%p2649_p13)
}
  0x6c   : > { %2415 = dma.hbm_to_vmem [thread:$0]  (!%p3259_p12), %s650_s12, 64, %s653_s27, %s3269_s25  }
  0x6d   : > { %s3733_s3 = sld [smem:[#allocation47_spill]]  ;;  %s681_s10 = scalar_lea.vmem [#allocation10], %s3252_s5 }
  0x6e   : > { %s689_s19 = sshll.u32 %s681_s10, 4  ;;  %s3287_s14 = scalar_lea.sflag [#allocation11], %s641_s24  ;;  %s690_s19 = int_to_ptr.vmem [resolvable:$true] %s689_s19 }
  0x6f   : > { %s2666_s18 = scalar_lea.vmem %s690_s19, 64  ;;  %s3011_s21 = smov [#allocation10]  }
  0x70   : > { %p2667_p2 = scmp.ne.s32.totalorder %s690_s19, %s2666_s18  ;;  %s2671_s11 = sshll.u32 %s3011_s21, 4  ;;  %s2672_s11 = int_to_ptr.vmem [resolvable:$false] %s2671_s11 }
  0x71   : > { %s2673_s9 = scalar_lea.vmem %s2672_s11, 128  ;;  %p2674_p9 = scmp.lt.s32.totalorder %s690_s19, %s2672_s11 }
  0x72   : > { %p2669_p1 = pnand %p2667_p2, %p3273_p0  ;;  %p2675_p8 = scmp.lt.s32.totalorder %s2673_s9, %s2666_s18 }
  0x73   : > { %s687_s16 = scalar_lea.hbm %s3733_s3, %s3255_s7 }
  0x74   : > { %p2670_p13 = pneg %p2669_p1  ;;  %p2676_p10 = por %p2675_p8, %p2674_p9 }
  0x76   : > { %p2677_p11 = pnand %p2676_p10, %p2670_p13 }
  0x78   : > { %2680 = shalt.err (!%p2677_p11)
}
  0x79   : > { %2421 = dma.hbm_to_vmem [thread:$0]  (!%p3259_p12), %s687_s16, 64, %s690_s19, %s3287_s14  }
  0x7a   : > { %s3012_s10 = smov [#allocation15]   ;;  %s3013_s12 = smov [#allocation18]  }
  0x7b   : > { %s533_s27 = sshll.u32 %s3012_s10, 4  ;;  %s557_s24 = sshll.u32 %s3013_s12, 4  ;;  %s534_s27 = int_to_ptr.vmem [resolvable:$true] %s533_s27  ;;  %s558_s24 = int_to_ptr.vmem [resolvable:$true] %s557_s24 }
  0x7c   : > { %s2692_s23 = scalar_lea.vmem %s534_s27, 16  ;;  %s2699_s22 = scalar_lea.vmem %s534_s27, 32 }
  0x7d   : > { %p2693_p2 = scmp.ne.s32.totalorder %s534_s27, %s2692_s23  ;;  %p2700_p4 = scmp.lt.s32.totalorder %s534_s27, %s534_s27 }
  0x7e   : > { %p2701_p9 = scmp.lt.s32.totalorder %s2699_s22, %s2692_s23 }
  0x7f   : > { %p2695_p1 = pnand %p2693_p2, %p3180_p7 }
  0x80   : > { %p2702_p13 = por %p2701_p9, %p2700_p4 }
  0x81   : > { %p2696_p5 = pneg %p2695_p1 }
  0x83   : > { %p2703_p8 = pnand %p2702_p13, %p2696_p5 }
  0x85   : > { %2706 = shalt.err (!%p2703_p8)
}
  0x86   : > { %s3734_s6 = sld [smem:[#allocation49_spill]]  ;;  %s2718_s19 = scalar_lea.vmem %s558_s24, 16 }
  0x87   : > { %p2719_p10 = scmp.ne.s32.totalorder %s558_s24, %s2718_s19  ;;  %s2725_s18 = scalar_lea.vmem %s558_s24, 32 }
  0x88   : > { %p2726_p1 = scmp.lt.s32.totalorder %s558_s24, %s558_s24  ;;  %p2727_p3 = scmp.lt.s32.totalorder %s2725_s18, %s2718_s19 }
  0x89   : > { %p2721_p11 = pnand %p2719_p10, %p3180_p7 }
  0x8a   : > { %p2728_p12 = por %p2727_p3, %p2726_p1 }
  0x8b   : > { %p2722_p2 = pneg %p2721_p11 }
  0x8c   : > { %2393 = dma.hbm_to_vmem [thread:$0]  (!%p3174_p6), %s3734_s6, 16, %s534_s27, [#allocation14]  }
  0x8d   : > { %p2729_p4 = pnand %p2728_p12, %p2722_p2 }
  0x8f   : > { %2732 = shalt.err (!%p2729_p4)
}
  0x90   : > { %s3735_s8 = sld [smem:[#allocation51_spill]]  ;;  %s3014_s10 = smov [#allocation21]  }
  0x91   : > { %s589_s27 = sshll.u32 %s3014_s10, 4  ;;  %s3015_s12 = smov [#allocation22]   ;;  %s590_s27 = int_to_ptr.vmem [resolvable:$true] %s589_s27 }
  0x92   : > { %s605_s23 = sshll.u32 %s3015_s12, 4  ;;  %s2744_s22 = scalar_lea.vmem %s590_s27, 256  ;;  %s606_s23 = int_to_ptr.vmem [resolvable:$true] %s605_s23 }
  0x93   : > { %p2745_p5 = scmp.ne.s32.totalorder %s590_s27, %s2744_s22  ;;  %p2752_p3 = scmp.lt.s32.totalorder %s590_s27, %s590_s27 }
  0x94   : > { %p2753_p12 = scmp.lt.s32.totalorder %s2744_s22, %s2744_s22 }
  0x95   : > { %p2747_p9 = pnand %p2745_p5, %p3180_p7 }
  0x96   : > { %2399 = dma.hbm_to_vmem [thread:$0]  (!%p3174_p6), %s3735_s8, 16, %s558_s24, [#allocation17]  }
  0x97   : > { %p2748_p13 = pneg %p2747_p9  ;;  %p2754_p8 = por %p2753_p12, %p2752_p3 }
  0x99   : > { %p2755_p10 = pnand %p2754_p8, %p2748_p13 }
  0x9b   : > { %2758 = shalt.err (!%p2755_p10)
}
  0x9c   : > { %s3736_s9 = smov 4   ;;  %s3737_s16 = smov 64  }
  0x9d   : > { %2405 = dma.hbm_to_vmem [thread:$0]  (!%p3174_p6), %s3666_s13, 256, %s590_s27, [#allocation20], %s3737_s16, %s3737_s16, %s3736_s9  }
  0x9e   : > { %s2770_s18 = scalar_lea.vmem %s606_s23, 256  ;;  %p2778_p4 = scmp.lt.s32.totalorder %s606_s23, %s606_s23 }
  0x9f   : > { %p2771_p11 = scmp.ne.s32.totalorder %s606_s23, %s2770_s18  ;;  %p2779_p5 = scmp.lt.s32.totalorder %s2770_s18, %s2770_s18 }
  0xa1   : > { %p2773_p2 = pnand %p2771_p11, %p3180_p7  ;;  %p2780_p9 = por %p2779_p5, %p2778_p4 }
  0xa3   : > { %p2774_p1 = pneg %p2773_p2 }
  0xa5   : > { %p2781_p13 = pnand %p2780_p9, %p2774_p1 }
  0xa7   : > { %2784 = shalt.err (!%p2781_p13)
}
  0xa8   : > { %2408 = dma.hbm_to_vmem [thread:$0]  (!%p3174_p6), %s3668_s15, 256, %s606_s23, [#allocation23], %s3737_s16, %s3737_s16, %s3736_s9  }
  0xa9   : > { %s3738_s27 = sld [smem:[#allocation44_spill]]  ;;  %s626_s22 = scalar_lea.vmem [#allocation4], %s3252_s5 }
  0xaa   : > { %s634_s24 = sshll.u32 %s626_s22, 4  ;;  %s3739_s18 = sld [smem:[#allocation46_spill]]  ;;  %s635_s24 = int_to_ptr.vmem [resolvable:$true] %s634_s24 }
  0xab   : > { %s3740_s6 = sand.u32 1, %s2991_s29   ;;  %s2798_s21 = scalar_lea.vmem %s635_s24, 64 }
  0xac   : > { %s623_s8 = scalar_lea.sflag [#allocation5], %s3740_s6  ;;  %p2799_p7 = scmp.ne.s32.totalorder %s635_s24, %s2798_s21 }
  0xad   : > { %s3016_s11 = smov [#allocation4]  }
  0xae   : > { %p2801_p3 = pnand %p2799_p7, %p3273_p0  ;;  %s2803_s23 = sshll.u32 %s3016_s11, 4  ;;  %s2804_s23 = int_to_ptr.vmem [resolvable:$false] %s2803_s23 }
  0xaf   : > { %s632_s12 = scalar_lea.hbm %s3738_s27, %s3255_s7  ;;  %s2805_s9 = scalar_lea.vmem %s2804_s23, 128 }
  0xb0   : > { %s668_s3 = scalar_lea.hbm %s3739_s18, %s3255_s7  ;;  %p2802_p12 = pneg %p2801_p3 }
  0xb1   : > { %p2806_p6 = scmp.lt.s32.totalorder %s635_s24, %s2804_s23  ;;  %p2807_p8 = scmp.lt.s32.totalorder %s2805_s9, %s2798_s21 }
  0xb3   : > { %p2808_p10 = por %p2807_p8, %p2806_p6 }
  0xb5   : > { %p2809_p11 = pnand %p2808_p10, %p2802_p12 }
  0xb7   : > { %2812 = shalt.err (!%p2809_p11)
}
  0xb8   : > { %p3741_p2 = scmp.ne.s32.totalorder %s3730_s30, 0  ;;  %s663_s6 = scalar_lea.vmem [#allocation9], %s3252_s5 }
  0xb9   : > { %s670_s16 = sshll.u32 %s663_s6, 4  ;;  %s705_s27 = scalar_lea.hbm %s3657_s4, %s3255_s7  ;;  %s671_s16 = int_to_ptr.vmem [resolvable:$true] %s670_s16 }
  0xba   : > { %2412 = dma.hbm_to_vmem [thread:$0]  (!%p3741_p2), %s632_s12, 64, %s635_s24, %s623_s8  }
  0xbb   : > { %s2826_s22 = scalar_lea.vmem %s671_s16, 64  ;;  %s3017_s2 = smov [#allocation9]  }
  0xbc   : > { %p2827_p1 = scmp.ne.s32.totalorder %s671_s16, %s2826_s22  ;;  %s2831_s19 = sshll.u32 %s3017_s2, 4  ;;  %s2832_s19 = int_to_ptr.vmem [resolvable:$false] %s2831_s19 }
  0xbd   : > { %s2833_s21 = scalar_lea.vmem %s2832_s19, 128  ;;  %p2834_p9 = scmp.lt.s32.totalorder %s671_s16, %s2832_s19 }
  0xbe   : > { %p2829_p4 = pnand %p2827_p1, %p3273_p0  ;;  %p2835_p13 = scmp.lt.s32.totalorder %s2833_s21, %s2826_s22 }
  0xc0   : > { %p2830_p5 = pneg %p2829_p4  ;;  %p2836_p7 = por %p2835_p13, %p2834_p9 }
  0xc2   : > { %p2837_p3 = pnand %p2836_p7, %p2830_p5 }
  0xc4   : > { %2840 = shalt.err (!%p2837_p3)
}
  0xc5   : > { %2418 = dma.hbm_to_vmem [thread:$0]  (!%p3741_p2), %s668_s3, 64, %s671_s16, %s3269_s25  }
  0xc6   : > { %s700_s24 = scalar_lea.vmem [#allocation12], %s3252_s5  ;;  %s3018_s9 = smov [#allocation12]  }
  0xc7   : > { %s707_s11 = sshll.u32 %s700_s24, 4  ;;  %s2859_s6 = sshll.u32 %s3018_s9, 4  ;;  %s708_s11 = int_to_ptr.vmem [resolvable:$true] %s707_s11  ;;  %s2860_s6 = int_to_ptr.vmem [resolvable:$false] %s2859_s6 }
  0xc8   : > { %s2854_s23 = scalar_lea.vmem %s708_s11, 64  ;;  %s2861_s17 = scalar_lea.vmem %s2860_s6, 128 }
  0xc9   : > { %p2855_p12 = scmp.ne.s32.totalorder %s708_s11, %s2854_s23  ;;  %p2862_p10 = scmp.lt.s32.totalorder %s708_s11, %s2860_s6 }
  0xca   : > { %p2863_p11 = scmp.lt.s32.totalorder %s2861_s17, %s2854_s23 }
  0xcb   : > { %p2857_p6 = pnand %p2855_p12, %p3273_p0 }
  0xcc   : > { %p2864_p1 = por %p2863_p11, %p2862_p10 }
  0xcd   : > { %p2858_p8 = pneg %p2857_p6 }
  0xcf   : > { %p2865_p4 = pnand %p2864_p1, %p2858_p8 }
  0xd1   : > { %2868 = shalt.err (!%p2865_p4)
}
  0xd2   : > { %2424 = dma.hbm_to_vmem [thread:$0]  (!%p3741_p2), %s705_s27, 64, %s708_s11, %s3287_s14  }
  0xd3   : > { %p3742_p0 = scmp.ne.s32.totalorder %s3716_s20, 0 }
  0xd4   : > { %s3372_s0 = sand.u32 (!%p3742_p0), 1, %s2987_s28   ;;  %p3743_p5 = scmp.ne.s32.totalorder (!%p3742_p0), %s3724_s26, 0 }
  0xd5   : > { %716 = sbr.rel (%p3742_p0) target bundleno = 1748 (0x6d4), region = 88  ;;  %s3375_s25 = sshll.u32 (!%p3742_p0), %s3372_s0, 2 }
  0xd6   : > { %s719_s30 = scalar_lea.sflag (!%p3742_p0), [#allocation5], %s3372_s0  ;;  %s722_s16 = scalar_lea.vmem (!%p3742_p0), [#allocation4], %s3375_s25 }
  0xda   : > { %2946 = dma.done.wait (%p3743_p5), %s719_s30, 64  }
  0xdb   : > { %2948 = vsyncadd (%p3743_p5), %s719_s30, 4294967232  ;;  %s727_s7 = sand.u32 1, %s3160_s1   ;;  %s731_s20 = scalar_lea.vmem [#allocation7], %s3375_s25 }
  0xdc   : > { %s728_s14 = scalar_lea.sflag [#allocation8], %s727_s7 }
  0xdd   : > { %2950 = dma.done.wait (%p3743_p5), %s728_s14, 128  }
  0xde   : > { %2952 = vsyncadd (%p3743_p5), %s728_s14, 4294967168  ;;  %s740_s10 = scalar_lea.vmem [#allocation9], %s3375_s25  ;;  %s746_s27 = scalar_lea.sflag [#allocation11], %s727_s7 }
  0xdf   : > { %s749_s22 = scalar_lea.vmem [#allocation10], %s3375_s25 }
  0xe0   : > { %2954 = dma.done.wait (%p3743_p5), %s746_s27, 128  }
  0xe1   : > { %2956 = vsyncadd (%p3743_p5), %s746_s27, 4294967168  ;;  %s758_s2 = scalar_lea.vmem [#allocation12], %s3375_s25  ;;  %p3744_p2 = scmp.eq.s32.totalorder %s3160_s1, 0 }
  0xe3   : > { %2958 = dma.done.wait (%p3744_p2), [#allocation14], 272   ;;  %p3745_p9 = pmov %p3744_p2 }
  0xe4   : > { %p3746_p13 = pmov %p3744_p2 }
  0xe5   : > { %2960 = vsyncadd (%p3745_p9), [#allocation14], 4294967024 }
  0xe6   : > { %2962 = dma.done.wait (%p3746_p13), [#allocation17], 272   ;;  %p3747_p7 = pmov %p3744_p2 }
  0xe7   : > { %p3748_p3 = pmov %p3744_p2 }
  0xe8   : > { %2964 = vsyncadd (%p3747_p7), [#allocation17], 4294967024 }
  0xe9   : > { %2966 = dma.done.wait (%p3748_p3), [#allocation20], 512   ;;  %p3749_p12 = pmov %p3744_p2 }
  0xea   : > { %p3750_p6 = pmov %p3744_p2 }
  0xeb   : > { %2968 = vsyncadd (%p3749_p12), [#allocation20], 4294966784 }
  0xec   : > { %2970 = dma.done.wait (%p3750_p6), [#allocation23], 256   ;;  %p3751_p8 = pmov %p3744_p2 }
  0xed   : > { %v3019_v0 = vmov 0.0   ;;  %vm3020_vm0 = vmmov 0   ;;  %v2518_v1 = vld [vmem:[#allocation16 + $0x8] sm:$0xff]   ;;  %v2520_v3 = vld [vmem:[#allocation16] sm:$0xff]   ;;  %vm895_vm1 = vcmask 261120   ;;  %s3752_s19 = sld [smem:[#allocation52_spill]] }
  0xee   : > { %2972 = vsyncadd (%p3751_p8), [#allocation23], 4294967040  ;;  %2249 = vmatprep.subr.bf16.mxu0 %v3019_v0  ;;  %2257 = vmatprep.subr.bf16.mxu1 %v3019_v0  ;;  %v2519_v2 = vld [vmem:[#allocation21 + $0x8] sm:$0xff]   ;;  %v2521_v4 = vld [vmem:[#allocation21] sm:$0xff]   ;;  %s3754_s23 = sld [smem:[#allocation56_spill]]  ;;  %s3021_s9 = smov 16  }
  0xef   : > { %2253 = vmatprep.mubr.msk.bf16.mxu0 %vm3020_vm0, %v3019_v0  ;;  %2261 = vmatprep.mubr.msk.bf16.mxu1 %vm3020_vm0, %v3019_v0  ;;  %v869_v5 = vld [vmem:[%s731_s20] sm:$0xf]  ;;  %v870_v7 = vld [vmem:[%s758_s2] sm:$0xf]  ;;  %v2524_v8 = vld [vmem:[#allocation13 + $0x8] sm:$0xff]   ;;  %s3022_s6 = smov 8  }
  0xf0   : > { %2250 = vmatpush3.bf16.msra.mxu0 %v2518_v1  ;;  %2258 = vmatpush3.bf16.msra.mxu1 %v2519_v2  ;;  %v2526_v10 = vld [vmem:[#allocation13] sm:$0xff]   ;;  %v871_v11 = vld [vmem:[%s740_s10] sm:$0xf]  ;;  %v1116_v13 = vld [vmem:[%s722_s16] sm:$0xf]  ;;  %s3755_s5 = sld [smem:[#allocation53_spill]] }
  0xf1   : > { %2251 = vmatprep.subr.bf16.mxu0 %v3019_v0  ;;  %2259 = vmatprep.subr.bf16.mxu1 %v3019_v0  ;;  %v2525_v12 = vld [vmem:[#allocation19 + $0x8] sm:$0xff]   ;;  %v2527_v14 = vld [vmem:[#allocation19] sm:$0xff]   ;;  %v2170_v18 = vld [vmem:[#allocation18] ss:$0 sm:$0xff]  ;;  %vm1114_vm2 = vcmask 257024   ;;  %s3023_s25 = smov 24  }
  0xf2   : > { %v1117_v15 = vld [vmem:[%s749_s22] sm:$0xf]  ;;  %s3756_s7 = sld [smem:[#allocation55_spill]]  ;;  %s3024_s14 = smov 32   ;;  %vm1356_vm3 = vcmask 1043456   ;;  %vm1023_vm4 = vcmask 64512  }
  0xf3   : > { %s3753_s21 = smov %s3752_s19  ;;  %v2522_v6 = vld [vmem:[%s3752_s19 + $0x8] sm:$0xff]   ;;  %v2182_v30 = vld [vmem:[#allocation15] ss:$0 sm:$0xff]  ;;  %vm1027_vm5 = vcmask 130048   ;;  %vm1030_vm6 = vcmask 195584   ;;  %vm1035_vm7 = vcmask 326656  }
  0xf4   : > { %2252 = vmatpush3.bf16.msra.mxu0 %v2520_v3  ;;  %2260 = vmatpush3.bf16.msra.mxu1 %v2521_v4  ;;  %v2523_v9 = vld [vmem:[%s3753_s21] sm:$0xff]   ;;  %vm1038_vm8 = vcmask 392192   ;;  %vm1041_vm9 = vcmask 457728   ;;  %vm1045_vm10 = vcmask 519168   ;;  %s3025_s20 = smov 112   ;;  %s3026_s10 = smov 96  }
  0xf5   : > { %2265 = vmatprep.subr.bf16.mxu0 %v3019_v0  ;;  %2273 = vmatprep.subr.bf16.mxu1 %v3019_v0  ;;  %v2174_v16 = vld [vmem:[%s3754_s23] ss:$0 sm:$0xff]  ;;  %s3027_s27 = smov 80   ;;  %s3028_s22 = smov 120   ;;  %vm1351_vm11 = vcmask 60416  }
  0xf6   : > { %v2178_v28 = vld [vmem:[%s3755_s5] ss:$0 sm:$0xff]  ;;  %s3029_s2 = smov 104   ;;  %s2169_s1 = sshll.u32 %s3372_s0, 4 }
  0xf7   : > { %2254 = vmatmul.mubr.msk.bf16.vlgmr.msra.gmra.mxu0 %vm895_vm1, %v869_v5  ;;  %2262 = vmatmul.mubr.msk.bf16.vlgmr.msra.gmra.mxu1 %vm895_vm1, %v870_v7  ;;  %s3532_s26 = scalar_lea.vmem [#allocation25], %s2169_s1  ;;  %s3757_s19 = sld [smem:[#allocation37_spill]] }
  0xf8   : > { %2266 = vmatpush3.bf16.msra.mxu0 %v2522_v6  ;;  %2274 = vmatpush3.bf16.msra.mxu1 %v2524_v8  ;;  %v2186_v43 = vld [vmem:[%s3756_s7] ss:$0 sm:$0xff]  ;;  %s3758_s8 = sld [smem:[#allocation41_spill]]  ;;  %s1863_s24 = sshll.u32 %s3532_s26, 4  ;;  %s3571_s24 = int_to_ptr.vmem [resolvable:$true] %s1863_s24 }
  0xf9   : > { %2267 = vmatprep.subr.bf16.mxu0 %v3019_v0  ;;  %2269 = vmatprep.mubr.msk.bf16.mxu0 %vm3020_vm0, %v3019_v0  ;;  %s1835_s17 = scalar_lea.sflag [#allocation26], %s3372_s0  ;;  %s2869_s3 = scalar_lea.vmem %s3571_s24, 256 }
  0xfa   : > { %2275 = vmatprep.subr.bf16.mxu1 %v3019_v0  ;;  %2277 = vmatprep.mubr.msk.bf16.mxu1 %vm3020_vm0, %v3019_v0  ;;  %p2870_p10 = scmp.ne.s32.totalorder %s3571_s24, %s2869_s3  ;;  %s3030_s5 = smov [#allocation25]  }
  0xfc   : > { %2268 = vmatpush3.bf16.msra.mxu0 %v2523_v9  ;;  %2276 = vmatpush3.bf16.msra.mxu1 %v2526_v10 }
  0xfd   : > { %2281 = vmatprep.subr.bf16.mxu0 %v3019_v0  ;;  %2289 = vmatprep.subr.bf16.mxu1 %v3019_v0  ;;  %s2214_s12 = sshll.u32 %s3757_s19, 8 }
  0xfe   : > { %p3760_p11 = scmp.ne.s32.totalorder %s3758_s8, 0 }
  0xff   : > { %2270 = vmatmul.mubr.msk.bf16.vlgmr.msra.gmra.mxu0 %vm895_vm1, %v871_v11  ;;  %2278 = vmatmul.mubr.msk.bf16.vlgmr.msra.gmra.mxu1 %vm895_vm1, %v1116_v13 }
 0x100   : > { %2282 = vmatpush3.bf16.msra.mxu0 %v2525_v12  ;;  %2285 = vmatprep.mubr.msk.bf16.mxu0 %vm3020_vm0, %v3019_v0  ;;  %p2871_p1 = pnand %p2870_p10, %p3760_p11 }
 0x101   : > { %2283 = vmatprep.subr.bf16.mxu0 %v3019_v0  ;;  %2291 = vmatprep.mubr.msk.bf16.mxu1 %vm3020_vm0, %v3019_v0 }
 0x102   : > { %p2872_p4 = pneg %p2871_p1 }
 0x104   : > { %2284 = vmatpush3.bf16.msra.mxu0 %v2527_v14 }
 0x105   : > { %2295 = vmatprep.subr.bf16.mxu0 %v3019_v0 }
 0x107   : > { %2286 = vmatmul.mubr.msk.bf16.vlgmr.msra.gmra.mxu0 %vm895_vm1, %v1117_v15 }
 0x108   : > { %2297 = vmatprep.mubr.msk.bf16.mxu0 %vm3020_vm0, %v3019_v0 }
 0x1b7   : > { %v933_v17 = vpop.f32.mrf.mxu0  ;;  %v1000_v19 = vpop.f32.mrf.mxu1 }
 0x1b8   : > { %v1001_v20 = vadd.f32 %v2174_v16, %v1000_v19  ;;  %v934_v23 = vadd.f32 %v2170_v18, %v933_v17 }
 0x1b9   : > { %v2255_v21 = vpop.f32.mrf.mxu0  ;;  %v2263_v22 = vpop.f32.mrf.mxu1 }
 0x1ba   : > { %v1006_v24 = vpack.c.bf16 %v1001_v20, %v1001_v20  ;;  %v939_v31 = vpack.c.bf16 %v934_v23, %v934_v23 }
 0x1bb   : > { %v936_v25 = vpop.f32.mrf.mxu0  ;;  %v1003_v26 = vpop.f32.mrf.mxu1 }
 0x1bc   : > { %1013 = vrot.lane.b32.xlu1 %v1006_v24, %s3021_s9  ;;  %1008 = vrot.lane.b32.xlu0 %v1006_v24, %s3022_s6 }
 0x1bd   : > { %v2256_v27 = vpop.f32.mrf.mxu0  ;;  %v2264_v29 = vpop.f32.mrf.mxu1 }
 0x1bf   : > { %v1107_v32 = vpop.f32.mrf.mxu0  ;;  %v1179_v34 = vpop.f32.mrf.mxu1 }
 0x1c0   : > { %v1108_v33 = vadd.f32 %v2178_v28, %v1107_v32  ;;  %1015 = vrot.lane.b32.xlu1 %v939_v31, %s3021_s9  ;;  %1011 = vrot.lane.b32.xlu0 %v939_v31, %s3022_s6  ;;  %v1180_v36 = vadd.f32 %v2182_v30, %v1179_v34 }
 0x1c1   : > { %v2271_v35 = vpop.f32.mrf.mxu0  ;;  %v2279_v38 = vpop.f32.mrf.mxu1 }
 0x1c2   : > { %v1113_v37 = vpack.c.bf16 %v1108_v33, %v1108_v33  ;;  %v1185_v41 = vmul.f32 0.35355338, %v1180_v36 }
 0x1c3   : > { %v1110_v39 = vpop.f32.mrf.mxu0  ;;  %v1182_v40 = vpop.f32.mrf.mxu1 }
 0x1c4   : > { %1115 = vst.msk [vmem:[#allocation3] sm:$0xf] %vm1114_vm2, %v1113_v37  ;;  %1019 = vrot.lane.b32.xlu1 %v939_v31, %s3023_s25  ;;  %1017 = vrot.lane.b32.xlu0 %v1006_v24, %s3023_s25  ;;  %v1186_v47 = vpack.c.bf16 %v1185_v41, %v1185_v41 }
 0x1c5   : > { %v2272_v42 = vpop.f32.mrf.mxu0  ;;  %v2280_v44 = vpop.f32.mrf.mxu1 }
 0x1c7   : > { %v1247_v45 = vpop.f32.mrf.mxu0 }
 0x1c8   : > { %v1248_v46 = vadd.f32 %v2186_v43, %v1247_v45  ;;  %1021 = vrot.lane.b32.xlu0 %v1006_v24, %s3024_s14 }
 0x1c9   : > { %v2287_v48 = vpop.f32.mrf.mxu0 }
 0x1ca   : > { %v1253_v49 = vmul.f32 0.35355338, %v1248_v46 }
 0x1cb   : > { %v1250_v50 = vpop.f32.mrf.mxu0  ;;  %v3472_v51 = vld [vmem:[#allocation3] sm:$0xf] }
 0x1cc   : > { %v1254_v52 = vpack.c.bf16 %v1253_v49, %v1253_v49  ;;  %v1358_v53 = vsel %vm1356_vm3, %v3472_v51, 0  ;;  %1259 = vrot.lane.b32.xlu0 %v1186_v47, %s3022_s6 }
 0x1cd   : > { %v2288_v54 = vpop.f32.mrf.mxu0  ;;  %2296 = vmatpush3.bf16.msra.mxu0 %v1358_v53 }
 0x1ce   : > { %1256 = vrot.lane.b32.xlu1 %v1254_v52, %s3022_s6  ;;  %2307 = vmatprep.subr.bf16.mxu0 %v3019_v0 }
 0x1d0   : > { %1263 = vrot.lane.b32.xlu0 %v1186_v47, %s3021_s9 }
 0x1d2   : > { %1261 = vrot.lane.b32.xlu1 %v1254_v52, %s3021_s9 }
 0x1d4   : > { %1267 = vrot.lane.b32.xlu0 %v1186_v47, %s3023_s25 }
 0x1d6   : > { %1265 = vrot.lane.b32.xlu1 %v1254_v52, %s3023_s25 }
 0x1da   : > { %1269 = vrot.lane.b32.xlu1 %v1254_v52, %s3024_s14 }
 0x22e   : > { %v1014_v55 = vpop.permute.xlu1 %1013  ;;  %v1009_v56 = vpop.permute.xlu0 %1008 }
 0x22f   : > { %v1026_v57 = vsel %vm1023_vm4, %v939_v31, %v1009_v56 }
 0x232   : > { %v1016_v58 = vpop.permute.xlu1 %1015  ;;  %v1012_v59 = vpop.permute.xlu0 %1011 }
 0x233   : > { %v1029_v60 = vsel %vm1027_vm5, %v1026_v57, %v1012_v59 }
 0x234   : > { %v1032_v61 = vsel %vm1030_vm6, %v1029_v60, %v1014_v55 }
 0x235   : > { %v1034_v62 = vsel %vm895_vm1, %v1032_v61, %v1016_v58  ;;  %v2195_v58 = vcombine.low %v3472_v51, %v3472_v51 }
 0x236   : > { %v1018_v63 = vpop.permute.xlu0 %1017  ;;  %v1020_v1 = vpop.permute.xlu1 %1019 }
 0x237   : > { %v1037_v2 = vsel %vm1035_vm7, %v1034_v62, %v1018_v63 }
 0x238   : > { %v1040_v4 = vsel %vm1038_vm8, %v1037_v2, %v1020_v1 }
 0x23a   : > { %v1022_v3 = vpop.permute.xlu0 %1021 }
 0x23b   : > { %v1043_v5 = vsel %vm1041_vm9, %v1040_v4, %v1022_v3 }
 0x23c   : > { %1046 = vst.msk [vmem:[#allocation2] sm:$0xf] %vm1045_vm10, %v1043_v5 }
 0x23e   : > { %v1260_v6 = vpop.permute.xlu0 %1259 }
 0x240   : > { %v1257_v7 = vpop.permute.xlu1 %1256 }
 0x241   : > { %v1274_v8 = vsel %vm1023_vm4, %v1186_v47, %v1257_v7 }
 0x242   : > { %v1277_v9 = vsel %vm1027_vm5, %v1274_v8, %v1260_v6  ;;  %v1264_v12 = vpop.permute.xlu0 %1263 }
 0x243   : > { %v1292_v11 = vld [vmem:[#allocation2] sm:$0xf] }
 0x244   : > { %v1262_v10 = vpop.permute.xlu1 %1261  ;;  %v1297_v14 = vsel %vm1027_vm5, %v1292_v11, 0  ;;  %v2192_v15 = vcombine.low %v1292_v11, %v1292_v11 }
 0x245   : > { %v1280_v13 = vsel %vm1030_vm6, %v1277_v9, %v1262_v10  ;;  %2290 = vmatpush3.bf16.xpose.msra.mxu1 %v1297_v14 }
 0x246   : > { %1407 = vrot.lane.b32.xlu0 %v2192_v15, %s3025_s20  ;;  %2301 = vmatprep.subr.bf16.mxu1 %v3019_v0  ;;  %v1282_v16 = vsel %vm895_vm1, %v1280_v13, %v1264_v12  ;;  %v1268_v19 = vpop.permute.xlu0 %1267 }
 0x248   : > { %v1266_v17 = vpop.permute.xlu1 %1265 }
 0x249   : > { %v1285_v18 = vsel %vm1035_vm7, %v1282_v16, %v1266_v17 }
 0x24a   : > { %1523 = vrot.lane.b32.xlu0 %v2192_v15, %s3026_s10  ;;  %v1288_v20 = vsel %vm1038_vm8, %v1285_v18, %v1268_v19 }
 0x24c   : > { %v1270_v21 = vpop.permute.xlu1 %1269 }
 0x24d   : > { %v1291_v22 = vsel %vm1041_vm9, %v1288_v20, %v1270_v21 }
 0x24e   : > { %1402 = vrot.lane.b32.xlu1 %v1291_v22, %s3025_s20  ;;  %2292 = vmatmul.mubr.msk.bf16.vlgmr.msra.gmra.mxu1 %vm1027_vm5, %v1291_v22 }
 0x24f   : > { %1636 = vrot.lane.b32.xlu0 %v2192_v15, %s3027_s27  ;;  %2303 = vmatprep.mubr.msk.bf16.mxu1 %vm3020_vm0, %v3019_v0 }
 0x252   : > { %1521 = vrot.lane.b32.xlu1 %v1291_v22, %s3026_s10 }
 0x256   : > { %1634 = vrot.lane.b32.xlu1 %v1291_v22, %s3027_s27 }
 0x2b8   : > { %v1408_v23 = vpop.permute.xlu0 %1407 }
 0x2b9   : > { %v1413_v24 = vsel %vm1027_vm5, %v1408_v23, 0 }
 0x2ba   : > { %2302 = vmatpush3.bf16.xpose.msra.mxu1 %v1413_v24 }
 0x2bb   : > { %2313 = vmatprep.subr.bf16.mxu1 %v3019_v0 }
 0x2bc   : > { %v1524_v25 = vpop.permute.xlu0 %1523 }
 0x2bd   : > { %v1529_v27 = vsel %vm1027_vm5, %v1524_v25, 0 }
 0x2c0   : > { %v1403_v26 = vpop.permute.xlu1 %1402 }
 0x2c1   : > { %2304 = vmatmul.mubr.msk.bf16.vlgmr.msra.gmra.mxu1 %vm1027_vm5, %v1403_v26  ;;  %v1637_v28 = vpop.permute.xlu0 %1636 }
 0x2c2   : > { %2314 = vmatpush3.bf16.xpose.msra.mxu1 %v1529_v27  ;;  %2315 = vmatprep.mubr.msk.bf16.mxu1 %vm3020_vm0, %v3019_v0  ;;  %v1642_v30 = vsel %vm1027_vm5, %v1637_v28, 0 }
 0x2c3   : > { %2325 = vmatprep.subr.bf16.mxu1 %v3019_v0 }
 0x2c4   : > { %v1522_v29 = vpop.permute.xlu1 %1521 }
 0x2c8   : > { %v1635_v31 = vpop.permute.xlu1 %1634 }
 0x2c9   : > { %2316 = vmatmul.mubr.msk.bf16.vlgmr.msra.gmra.mxu1 %vm1027_vm5, %v1522_v29 }
 0x2ca   : > { %2326 = vmatpush3.bf16.xpose.msra.mxu1 %v1642_v30  ;;  %2327 = vmatprep.mubr.msk.bf16.mxu1 %vm3020_vm0, %v3019_v0 }
 0x2cb   : > { %2337 = vmatprep.subr.bf16.mxu1 %v3019_v0 }
 0x2d1   : > { %2328 = vmatmul.mubr.msk.bf16.vlgmr.msra.gmra.mxu1 %vm1027_vm5, %v1635_v31 }
 0x2d2   : > { %2341 = vmatprep.mubr.msk.bf16.mxu1 %vm3020_vm0, %v3019_v0 }
 0x30e   : > { %v1333_v32 = vpop.f32.mrf.mxu1 }
 0x30f   : > { %v1339_v33 = vsel %vm1023_vm4, %v1333_v32, -inf }
 0x310   : > { %1340 = vmax.xlane.f32.xlu0 %v1339_v33  ;;  %v2293_v34 = vpop.f32.mrf.mxu1 }
 0x312   : > { %v1336_v35 = vpop.f32.mrf.mxu1 }
 0x314   : > { %v2294_v36 = vpop.f32.mrf.mxu1 }
 0x315   : > { %v2529_v36 = vld [vmem:[#allocation22 + $0x8] sm:$0xff]  }
 0x316   : > { %2338 = vmatpush3.bf16.msra.mxu1 %v2529_v36 }
 0x317   : > { %2339 = vmatprep.subr.bf16.mxu1 %v3019_v0 }
 0x381   : > { %v1449_v37 = vpop.f32.mrf.mxu1 }
 0x382   : > { %v1455_v38 = vsel %vm1023_vm4, %v1449_v37, -inf }
 0x383   : > { %1456 = vmax.xlane.f32.xlu1 %v1455_v38  ;;  %v2305_v39 = vpop.f32.mrf.mxu1  ;;  %v2530_v38 = vld [vmem:[#allocation22] sm:$0xff]  }
 0x384   : > { %2340 = vmatpush3.bf16.msra.mxu1 %v2530_v38 }
 0x385   : > { %v1452_v40 = vpop.f32.mrf.mxu1 }
 0x387   : > { %v2306_v41 = vpop.f32.mrf.mxu1 }
 0x389   : > { %v1565_v42 = vpop.f32.mrf.mxu1 }
 0x38a   : > { %v1571_v43 = vsel %vm1023_vm4, %v1565_v42, -inf }
 0x38b   : > { %1572 = vmax.xlane.f32.xlu0 %v1571_v43  ;;  %v2317_v44 = vpop.f32.mrf.mxu1 }
 0x38d   : > { %v1568_v45 = vpop.f32.mrf.mxu1 }
 0x38f   : > { %v2318_v46 = vpop.f32.mrf.mxu1 }
 0x391   : > { %v1678_v47 = vpop.f32.mrf.mxu1 }
 0x392   : > { %v1684_v48 = vsel %vm1023_vm4, %v1678_v47, -inf }
 0x393   : > { %1685 = vmax.xlane.f32.xlu0 %v1684_v48  ;;  %v2329_v49 = vpop.f32.mrf.mxu1 }
 0x395   : > { %v1681_v50 = vpop.f32.mrf.mxu1 }
 0x397   : > { %v2330_v52 = vpop.f32.mrf.mxu1 }
 0x399   : > { %v1341_v53 = vpop.xlane.xlu0 %1340 }
 0x39a   : > { %v1342_v54 = vsub.f32 %v1333_v32, %v1341_v53 }
 0x39c   : > { %v1343_v55 = vmul.f32 1.442695, %v1342_v54 }
 0x39e   : > { %2531 = vpow2.f32 %v1343_v55 }
 0x3ab   : > { %v2532_v56 = vpop.eup %2531 }
 0x3ac   : > { %v1345_v57 = vsel %vm1023_vm4, %v2532_v56, 0.0 }
 0x3ad   : > { %1346 = vadd.xlane.f32.xlu1 %v1345_v57 }
 0x3be   : > { %1472 = vrot.lane.b32.xlu1 %v2195_v58, %s3028_s22 }
 0x40c   : > { %v1457_v59 = vpop.xlane.xlu1 %1456 }
 0x40d   : > { %v1458_v60 = vsub.f32 %v1449_v37, %v1457_v59 }
 0x40f   : > { %v1459_v61 = vmul.f32 1.442695, %v1458_v60 }
 0x411   : > { %2533 = vpow2.f32 %v1459_v61 }
 0x414   : > { %v1573_v62 = vpop.xlane.xlu0 %1572 }
 0x415   : > { %v1574_v63 = vsub.f32 %v1565_v42, %v1573_v62 }
 0x417   : > { %v1575_v1 = vmul.f32 1.442695, %v1574_v63 }
 0x419   : > { %2535 = vpow2.f32 %v1575_v1 }
 0x41c   : > { %v1686_v2 = vpop.xlane.xlu0 %1685 }
 0x41d   : > { %v1687_v3 = vsub.f32 %v1678_v47, %v1686_v2 }
 0x41e   : > { %v2534_v4 = vpop.eup %2533 }
 0x41f   : > { %v1688_v5 = vmul.f32 1.442695, %v1687_v3  ;;  %v1461_v6 = vsel %vm1023_vm4, %v2534_v4, 0.0 }
 0x420   : > { %1462 = vadd.xlane.f32.xlu0 %v1461_v6 }
 0x421   : > { %2537 = vpow2.f32 %v1688_v5 }
 0x426   : > { %v2536_v51 = vpop.eup %2535 }
 0x427   : > { %v1577_v7 = vsel %vm1023_vm4, %v2536_v51, 0.0 }
 0x428   : > { %1578 = vadd.xlane.f32.xlu1 %v1577_v7 }
 0x42e   : > { %v2538_v8 = vpop.eup %2537 }
 0x42f   : > { %v1690_v9 = vsel %vm1023_vm4, %v2538_v8, 0.0 }
 0x430   : > { %1691 = vadd.xlane.f32.xlu0 %v1690_v9 }
 0x436   : > { %v1347_v10 = vpop.xlane.xlu1 %1346 }
 0x437   : > { %2539 = vrcp.f32 %v1347_v10 }
 0x439   : > { %1698 = vrot.lane.b32.xlu1 %v2195_v58, %s3029_s2 }
 0x43a   : > { %v1473_v13 = vpop.permute.xlu1 %1472 }
 0x43b   : > { %v1478_v15 = vsel %vm1356_vm3, %v1473_v13, 0 }
 0x444   : > { %v2540_v11 = vpop.eup %2539 }
 0x445   : > { %v1349_v12 = vmul.f32 %v2540_v11, %v2532_v56 }
 0x446   : > { %1585 = vrot.lane.b32.xlu0 %v2195_v58, %s3025_s20 }
 0x447   : > { %v1350_v14 = vpack.c.bf16 %v1349_v12, %v1349_v12 }
 0x449   : > { %1352 = vst.msk [vmem:[%s3532_s26] sm:$0xf] %vm1351_vm11, %v1350_v14  ;;  %2298 = vmatmul.mubr.msk.bf16.vlgmr.msra.gmra.mxu0 %vm1023_vm4, %v1350_v14 }
 0x44a   : > { %2308 = vmatpush3.bf16.msra.mxu0 %v1478_v15  ;;  %2309 = vmatprep.mubr.msk.bf16.mxu0 %vm3020_vm0, %v3019_v0 }
 0x44b   : > { %2319 = vmatprep.subr.bf16.mxu0 %v3019_v0 }
 0x4a9   : > { %v1463_v16 = vpop.xlane.xlu0 %1462 }
 0x4aa   : > { %2541 = vrcp.f32 %v1463_v16 }
 0x4b1   : > { %v1579_v17 = vpop.xlane.xlu1 %1578 }
 0x4b2   : > { %2543 = vrcp.f32 %v1579_v17 }
 0x4b5   : > { %v1699_v26 = vpop.permute.xlu1 %1698 }
 0x4b6   : > { %v1704_v28 = vsel %vm1356_vm3, %v1699_v26, 0 }
 0x4b7   : > { %v2542_v18 = vpop.eup %2541 }
 0x4b8   : > { %v1465_v19 = vmul.f32 %v2542_v18, %v2534_v4 }
 0x4b9   : > { %v1692_v20 = vpop.xlane.xlu0 %1691 }
 0x4ba   : > { %2545 = vrcp.f32 %v1692_v20  ;;  %v1466_v21 = vpack.c.bf16 %v1465_v19, %v1465_v19 }
 0x4bc   : > { %2194 = vst.msk [vmem:[%s3532_s26 + $0x4] sm:$0xf] %vm1351_vm11, %v1466_v21  ;;  %2310 = vmatmul.mubr.msk.bf16.vlgmr.msra.gmra.mxu0 %vm1023_vm4, %v1466_v21 }
 0x4bd   : > { %v1586_v22 = vpop.permute.xlu0 %1585  ;;  %2321 = vmatprep.mubr.msk.bf16.mxu0 %vm3020_vm0, %v3019_v0 }
 0x4be   : > { %v1591_v23 = vsel %vm1356_vm3, %v1586_v22, 0 }
 0x4bf   : > { %v2544_v24 = vpop.eup %2543  ;;  %2320 = vmatpush3.bf16.msra.mxu0 %v1591_v23 }
 0x4c0   : > { %2331 = vmatprep.subr.bf16.mxu0 %v3019_v0  ;;  %v1581_v25 = vmul.f32 %v2544_v24, %v2536_v51 }
 0x4c2   : > { %v1582_v27 = vpack.c.bf16 %v1581_v25, %v1581_v25 }
 0x4c4   : > { %2198 = vst.msk [vmem:[%s3532_s26 + $0x8] sm:$0xf] %vm1351_vm11, %v1582_v27  ;;  %2322 = vmatmul.mubr.msk.bf16.vlgmr.msra.gmra.mxu0 %vm1023_vm4, %v1582_v27 }
 0x4c5   : > { %2332 = vmatpush3.bf16.msra.mxu0 %v1704_v28  ;;  %2333 = vmatprep.mubr.msk.bf16.mxu0 %vm3020_vm0, %v3019_v0 }
 0x4c7   : > { %v2546_v29 = vpop.eup %2545 }
 0x4c8   : > { %v1694_v30 = vmul.f32 %v2546_v29, %v2538_v8 }
 0x4ca   : > { %v1695_v31 = vpack.c.bf16 %v1694_v30, %v1694_v30 }
 0x4cc   : > { %2201 = vst.msk [vmem:[%s3532_s26 + $0xc] sm:$0xf] %vm1351_vm11, %v1695_v31  ;;  %2334 = vmatmul.mubr.msk.bf16.vlgmr.msra.gmra.mxu0 %vm1023_vm4, %v1695_v31 }
 0x509   : > { %v1394_v32 = vpop.f32.mrf.mxu0 }
 0x50a   : > { %v1400_v54 = vpack.c.bf16 %v1394_v32, %v1394_v32 }
 0x50b   : > { %v2299_v33 = vpop.f32.mrf.mxu0 }
 0x50d   : > { %v1397_v34 = vpop.f32.mrf.mxu0 }
 0x50f   : > { %v2300_v35 = vpop.f32.mrf.mxu0 }
 0x57c   : > { %v1514_v37 = vpop.f32.mrf.mxu0 }
 0x57d   : > { %v1520_v39 = vpack.c.bf16 %v1514_v37, %v1514_v37 }
 0x57e   : > { %v2311_v40 = vpop.f32.mrf.mxu0 }
 0x57f   : > { %1748 = vrot.lane.b32.xlu1 %v1520_v39, %s3022_s6 }
 0x580   : > { %v1517_v41 = vpop.f32.mrf.mxu0 }
 0x582   : > { %v2312_v42 = vpop.f32.mrf.mxu0 }
 0x584   : > { %v1627_v43 = vpop.f32.mrf.mxu0 }
 0x585   : > { %v1633_v44 = vpack.c.bf16 %v1627_v43, %v1627_v43 }
 0x586   : > { %v2323_v45 = vpop.f32.mrf.mxu0 }
 0x587   : > { %1751 = vrot.lane.b32.xlu0 %v1633_v44, %s3021_s9  ;;  %s3759_s9 = sld [smem:[#allocation59_spill]] }
 0x588   : > { %v1630_v46 = vpop.f32.mrf.mxu0 }
 0x58a   : > { %v2324_v47 = vpop.f32.mrf.mxu0 }
 0x58c   : > { %v1740_v48 = vpop.f32.mrf.mxu0 }
 0x58d   : > { %v1746_v49 = vpack.c.bf16 %v1740_v48, %v1740_v48  ;;  %s3569_s6 = scalar_lea.hbm %s3759_s9, %s2214_s12 }
 0x58e   : > { %v2335_v50 = vpop.f32.mrf.mxu0 }
 0x58f   : > { %1754 = vrot.lane.b32.xlu1 %v1746_v49, %s3023_s25  ;;  %s2873_s25 = sshll.u32 %s3030_s5, 4  ;;  %s2874_s25 = int_to_ptr.vmem [resolvable:$false] %s2873_s25 }
 0x590   : > { %v1743_v0 = vpop.f32.mrf.mxu0  ;;  %s2875_s30 = scalar_lea.vmem %s2874_s25, 512  ;;  %p2876_p0 = scmp.lt.s32.totalorder %s3571_s24, %s2874_s25 }
 0x591   : > { %p2877_p5 = scmp.lt.s32.totalorder %s2875_s30, %s2869_s3 }
 0x592   : > { %v2336_v52 = vpop.f32.mrf.mxu0 }
 0x593   : > { %p2878_p2 = por %p2877_p5, %p2876_p0 }
 0x595   : > { %p2879_p9 = pnand %p2878_p2, %p2872_p4 }
 0x5f1   : > { %v1749_v53 = vpop.permute.xlu1 %1748 }
 0x5f2   : > { %v1758_v56 = vsel %vm1023_vm4, %v1400_v54, %v1749_v53 }
 0x5f9   : > { %v1752_v55 = vpop.permute.xlu0 %1751 }
 0x5fa   : > { %v1760_v57 = vsel %vm1027_vm5, %v1758_v56, %v1752_v55 }
 0x601   : > { %v1755_v58 = vpop.permute.xlu1 %1754 }
 0x602   : > { %v1762_v59 = vsel %vm1030_vm6, %v1760_v57, %v1755_v58 }
 0x603   : > { %2342 = vmatmul.mubr.msk.bf16.vlgmr.msra.gmra.mxu1 %vm895_vm1, %v1762_v59 }
 0x604   : > { %2882 = shalt.err (!%p2879_p9)
}
 0x605   : > { %s2883_s16 = scalar_lea.hbm %s3569_s6, 256  ;;  %s2887_s20 = scalar_lea.hbm %s3759_s9, 512 }
 0x606   : > { %p2884_p13 = scmp.ne.s32.totalorder %s3569_s6, %s2883_s16  ;;  %p2888_p12 = scmp.lt.s32.totalorder %s3569_s6, %s3759_s9 }
 0x607   : > { %p2889_p6 = scmp.lt.s32.totalorder %s2887_s20, %s2883_s16 }
 0x608   : > { %p2885_p7 = pnand %p2884_p13, %p3760_p11 }
 0x609   : > { %p2890_p8 = por %p2889_p6, %p2888_p12 }
 0x60a   : > { %p2886_p3 = pneg %p2885_p7 }
 0x60c   : > { %p2891_p10 = pnand %p2890_p8, %p2886_p3 }
 0x60e   : > { %2894 = shalt.err (!%p2891_p10)
}
 0x60f   : > { %s3031_s22 = smov 64   ;;  %s3032_s2 = smov 4  }
 0x610   : > { %2384 = dma.vmem_to_hbm [thread:$0]  (%p3760_p11), %s3571_s24, 256, %s3569_s6, %s1835_s17, %s3031_s22, %s3031_s22, %s3032_s2  }
 0x611   : > { %s2168_s1 = sshll.u32 %s3372_s0, 3  ;;  %s3761_s11 = sld [smem:[#allocation57_spill]] }
 0x612   : > { %s2209_s23 = sshll.u32 %s3757_s19, 7  ;;  %s856_s3 = scalar_lea.vmem [#allocation24], %s2168_s1 }
 0x613   : > { %s1849_s5 = sshll.u32 %s856_s3, 4  ;;  %s3762_s16 = sld [smem:[#allocation58_spill]]  ;;  %s3606_s5 = int_to_ptr.vmem [resolvable:$true] %s1849_s5 }
 0x614   : > { %s1830_s24 = scalar_lea.sflag [#allocation6], %s3372_s0  ;;  %s2895_s19 = scalar_lea.vmem %s3606_s5, 128 }
 0x615   : > { %p2896_p1 = scmp.ne.s32.totalorder %s3606_s5, %s2895_s19  ;;  %s3033_s6 = smov [#allocation24]  }
 0x616   : > { %s2899_s17 = sshll.u32 %s3033_s6, 4  ;;  %s2900_s17 = int_to_ptr.vmem [resolvable:$false] %s2899_s17 }
 0x617   : > { %v2203_v60 = vld [vmem:[%s3761_s11] ss:$0 sm:$0xff]  ;;  %p2897_p4 = pnand %p2896_p1, %p3760_p11  ;;  %s2901_s14 = scalar_lea.vmem %s2900_s17, 256 }
 0x618   : > { %p2902_p5 = scmp.lt.s32.totalorder %s3606_s5, %s2900_s17  ;;  %p2903_p2 = scmp.lt.s32.totalorder %s2901_s14, %s2895_s19 }
 0x619   : > { %s3604_s7 = scalar_lea.hbm %s3762_s16, %s2209_s23  ;;  %p2898_p0 = pneg %p2897_p4 }
 0x61a   : > { %p2904_p9 = por %p2903_p2, %p2902_p5 }
 0x61c   : > { %p2905_p13 = pnand %p2904_p9, %p2898_p0 }
 0x6c3   : > { %v1822_v61 = vpop.f32.mrf.mxu1 }
 0x6c4   : > { %v1823_v62 = vadd.f32 %v2203_v60, %v1822_v61 }
 0x6c5   : > { %v2343_v63 = vpop.f32.mrf.mxu1 }
 0x6c6   : > { %1828 = vst.msk [vmem:[%s856_s3] sm:$0xff] %vm895_vm1, %v1823_v62 }
 0x6c7   : > { %v1825_v1 = vpop.f32.mrf.mxu1 }
 0x6c8   : > { %2908 = shalt.err (!%p2905_p13)
}
 0x6c9   : > { %s2909_s20 = scalar_lea.hbm %s3604_s7, 128  ;;  %s2913_s27 = scalar_lea.hbm %s3762_s16, 256 }
 0x6ca   : > { %p2910_p7 = scmp.ne.s32.totalorder %s3604_s7, %s2909_s20  ;;  %p2914_p6 = scmp.lt.s32.totalorder %s3604_s7, %s3762_s16 }
 0x6cb   : > { %p2915_p8 = scmp.lt.s32.totalorder %s2913_s27, %s2909_s20 }
 0x6cc   : > { %p2911_p3 = pnand %p2910_p7, %p3760_p11 }
 0x6cd   : > { %p2916_p10 = por %p2915_p8, %p2914_p6 }
 0x6ce   : > { %p2912_p12 = pneg %p2911_p3 }
 0x6d0   : > { %p2917_p1 = pnand %p2916_p10, %p2912_p12 }
 0x6d2   : > { %2920 = shalt.err (!%p2917_p1)
}
 0x6d3   : > { %2383 = dma.vmem_to_hbm [thread:$0]  (%p3760_p11), %s3606_s5, 128, %s3604_s7, %s1830_s24   ;;  %v2344_v2 = vpop.f32.mrf.mxu1 }
 0x6d4 PF: > { %s3763_s1 = sld [smem:[#allocation36_spill]] }
 0x6d5   : > { %s3764_s26 = sld [smem:[#allocation43_spill]] }
 0x6d6   : > { %s3765_s12 = sld [smem:[#allocation39_spill]] }
 0x6da   : > { %s1878_s11 = sand.u32 1, %s3763_s1  }
 0x6db   : > { %p3766_p4 = scmp.ne.s32.totalorder %s3764_s26, 0  ;;  %s1879_s23 = scalar_lea.sflag [#allocation6], %s1878_s11 }
 0x6dc   : > { %p3767_p0 = scmp.ge.s32.totalorder %s3765_s12, 2 }
 0x6de   : > { %p2426_p5 = pnand %p3767_p0, %p3766_p4 }
 0x6e0   : > { %p2427_p2 = pneg %p2426_p5 }
 0x6e2   : > { %2974 = dma.done.wait (%p2427_p2), %s1879_s23, 128  }
 0x6e3   : > { %2976 = vsyncadd (%p2427_p2), %s1879_s23, 4294967168  ;;  %s1888_s3 = scalar_lea.sflag [#allocation26], %s1878_s11 }
 0x6e4   : > { %2978 = dma.done.wait (%p2427_p2), %s1888_s3, 256  }
 0x6e5   : > { %2980 = vsyncadd (%p2427_p2), %s1888_s3, 4294967040  ;;  %s48_s19 = sadd.s32 1, %s3765_s12   ;;  %s3768_s8 = sld [smem:[#allocation42_spill]] }
 0x6e6   : > { %p45_p9 = scmp.ge.s32.totalorder %s48_s19, 4   ;;  %s3769_s30 = sld [smem:[#allocation38_spill]] }
 0x6e7   : > { %s3770_s0 = sld [smem:[#allocation40_spill]]  ;;  %s3771_s27 = smov %s2987_s28 }
 0x6e8   : > { %s3772_s28 = smov %s2991_s29  ;;  %47 = sbr.rel (!%p45_p9) target bundleno = 33 (0x21), region = 233 }
 0x6eb   : > { %s3773_s29 = smov %s3768_s8 }
 0x6ed   :  { %1893 = vsyncpa [#allocation5], 1 }
 0x6ee   :  { %1895 = vsyncpa [#allocation5 + $0x1], 1 }
 0x6ef   :  { %1896 = vsyncpa [#allocation8], 1 }
 0x6f0   :  { %1898 = vsyncpa [#allocation8 + $0x1], 1 }
 0x6f1   :  { %1899 = vsyncpa [#allocation11], 1 }
 0x6f2   :  { %1901 = vsyncpa [#allocation11 + $0x1], 1 }
 0x6f3   :  { %1902 = vsyncpa [#allocation14], 1 }
 0x6f4   :  { %1903 = vsyncpa [#allocation17], 1 }
 0x6f5   :  { %1904 = vsyncpa [#allocation20], 1 }
 0x6f6   :  { %1905 = vsyncpa [#allocation23], 1 }
 0x6f7   :  { %1906 = vsyncpa [#allocation6], 1 }
 0x6f8   :  { %1908 = vsyncpa [#allocation6 + $0x1], 1 }
 0x6f9   :  { %1909 = vsyncpa [#allocation26], 1 }
 0x6fa   :  { %1911 = vsyncpa [#allocation26 + $0x1], 1 }

</bundles_post_ra>
